<compile_context>
chip_gen: v7x
topology: tpu7x:2x2x1
jax: 0.10.0
libtpu: 0.0.40
codegen_flags: <defaults>
</compile_context>

<pallas_src>
import math

import jax
import jax.numpy as jnp
from jax.experimental import pallas as pl

# ----------------------------- small BERT config -----------------------------
VOCAB = 50
TYPE_VOCAB = 2
MAX_POS = 16
HIDDEN = 32
N_LAYERS = 2
N_HEADS = 4
HEAD_DIM = HIDDEN // N_HEADS
INTERMEDIATE = 64
LN_EPS = 1e-12


# ------------------------------ in-kernel helpers -----------------------------
def _layernorm(h, g, b):
    # One-pass stats: E[x] and E[x^2] are independent lane reductions.
    mu = jnp.mean(h, axis=-1, keepdims=True)
    ms = jnp.mean(h * h, axis=-1, keepdims=True)
    var = ms - mu * mu
    return (h - mu) * jax.lax.rsqrt(var + LN_EPS) * g + b


def _gelu(h):
    # TODO(synk): HF BERT uses exact erf-GELU; tanh approximation kept here for
    # guaranteed Mosaic lowering (~1e-3 deviation from the HF reference).
    c = math.sqrt(2.0 / math.pi)
    return 0.5 * h * (1.0 + jnp.tanh(c * (h + 0.044715 * h * h * h)))


# -------------------------------- fused kernel --------------------------------
def _make_encoder_kernel(batch, seq):
    scale = 1.0 / math.sqrt(HEAD_DIM)
    nrows = batch * seq

    def encoder_kernel(
        ids_ref,       # (B*S, 1) int32   word ids
        tids_ref,      # (B*S, 1) int32   token-type ids
        mask_ref,      # (B, 1, S) int32  attention mask (1 = keep, 0 = pad)
        wemb_ref,      # (VOCAB, H) f32
        pemb_ref,      # (MAX_POS, H) f32
        temb_ref,      # (TYPE_VOCAB, H) f32
        emb_g_ref, emb_b_ref,                    # (1, H)
        wqkv_ref, bqkv_ref,                      # (L, H, 3H), (L, 1, 3H)
        wo_ref, bo_ref,                          # (L, H, H),  (L, 1, H)
        ln1g_ref, ln1b_ref,                      # (L, 1, H)
        wi_ref, bi_ref,                          # (L, H, I),  (L, 1, I)
        wo2_ref, bo2_ref,                        # (L, I, H),  (L, 1, H)
        ln2g_ref, ln2b_ref,                      # (L, 1, H)
        o_ref,         # (B*S, H) f32
    ):
        f32 = jnp.float32

        # ---- embeddings in-kernel: one-hot matmuls == MXU-side "gather" ------
        ids = ids_ref[...]                                           # (B*S, 1)
        w_oh = (jax.lax.broadcasted_iota(jnp.int32, (nrows, VOCAB), 1)
                == ids).astype(f32)                                  # (B*S, V)
        x = jnp.dot(w_oh, wemb_ref[...], preferred_element_type=f32)

        tids = tids_ref[...]
        t_oh = (jax.lax.broadcasted_iota(jnp.int32, (nrows, TYPE_VOCAB), 1)
                == tids).astype(f32)
        x = x + jnp.dot(t_oh, temb_ref[...], preferred_element_type=f32)

        pos_rows = pemb_ref[0:seq, :]                                # (S, H)
        x = x + jnp.concatenate([pos_rows] * batch, axis=0)          # (B*S, H)

        x = _layernorm(x, emb_g_ref[...], emb_b_ref[...])

        # ---- additive attention mask, built & broadcast ONCE ------------------
        ext3 = (1.0 - mask_ref[...].astype(f32)) * -10000.0          # (B, 1, S)
        mask_bh = jnp.concatenate([ext3] * N_HEADS, axis=0)          # (NH*B, 1, S)

        def split_heads(m):  # (B*S, H) -> head-major (NH*B, S, Dh)
            return jnp.concatenate(
                [m[:, h * HEAD_DIM:(h + 1) * HEAD_DIM].reshape(batch, seq, HEAD_DIM)
                 for h in range(N_HEADS)],
                axis=0)

        for l in range(N_LAYERS):
            # ---- fused QKV projection: one MXU push, lane-dense (3H) output
            qkv = (jnp.dot(x, wqkv_ref[l], preferred_element_type=f32)
                   + bqkv_ref[l])                                    # (B*S, 3H)
            qh = split_heads(qkv[:, 0 * HIDDEN:1 * HIDDEN])
            kh = split_heads(qkv[:, 1 * HIDDEN:2 * HIDDEN])
            vh = split_heads(qkv[:, 2 * HIDDEN:3 * HIDDEN])

            # ---- attention for ALL (head, batch) pairs in one batched einsum
            s = jnp.einsum('bqd,bkd->bqk', qh, kh,
                           preferred_element_type=f32) * scale       # (NH*B, S, S)
            s = s + mask_bh
            # packed softmax over the whole (NH*B, S, S) tile
            s = s - jnp.max(s, axis=-1, keepdims=True)
            p = jnp.exp(s)
            p = p * pl.reciprocal(jnp.sum(p, axis=-1, keepdims=True), approx=True)
            ctx3 = jnp.einsum('bqk,bkd->bqd', p, vh,
                              preferred_element_type=f32)            # (NH*B, S, Dh)

            # merge heads back to (B*S, H); stays in vregs, one lane concat
            ctx = jnp.concatenate(
                [ctx3[h * batch:(h + 1) * batch].reshape(nrows, HEAD_DIM)
                 for h in range(N_HEADS)],
                axis=-1)                                             # (B*S, H)

            # ---- attention output projection + residual + LN
            attn_out = (jnp.dot(ctx, wo_ref[l], preferred_element_type=f32)
                        + bo_ref[l])
            x = _layernorm(attn_out + x, ln1g_ref[l], ln1b_ref[l])

            # ---- FFN (GELU) + residual + LN
            inter = _gelu(jnp.dot(x, wi_ref[l], preferred_element_type=f32)
                          + bi_ref[l])
            ffn_out = (jnp.dot(inter, wo2_ref[l], preferred_element_type=f32)
                       + bo2_ref[l])
            x = _layernorm(ffn_out + x, ln2g_ref[l], ln2b_ref[l])

        o_ref[...] = x

    return encoder_kernel


# ------------------------------- parameters -----------------------------------
def init_params(key):
    def normal(k, shape, sc=0.02):
        return (sc * jax.random.normal(k, shape)).astype(jnp.float32)

    ks = jax.random.split(key, 8)
    return {
        "word_emb": normal(ks[0], (VOCAB, HIDDEN)),
        "pos_emb": normal(ks[1], (MAX_POS, HIDDEN)),
        "type_emb": normal(ks[2], (TYPE_VOCAB, HIDDEN)),
        "emb_ln_g": jnp.ones((1, HIDDEN), jnp.float32),
        "emb_ln_b": jnp.zeros((1, HIDDEN), jnp.float32),
        # per-layer params stacked on a leading layer axis, QKV fused
        "wqkv": normal(ks[3], (N_LAYERS, HIDDEN, 3 * HIDDEN)),
        "bqkv": jnp.zeros((N_LAYERS, 1, 3 * HIDDEN), jnp.float32),
        "wo": normal(ks[4], (N_LAYERS, HIDDEN, HIDDEN)),
        "bo": jnp.zeros((N_LAYERS, 1, HIDDEN), jnp.float32),
        "ln1_g": jnp.ones((N_LAYERS, 1, HIDDEN), jnp.float32),
        "ln1_b": jnp.zeros((N_LAYERS, 1, HIDDEN), jnp.float32),
        "wi": normal(ks[5], (N_LAYERS, HIDDEN, INTERMEDIATE)),
        "bi": jnp.zeros((N_LAYERS, 1, INTERMEDIATE), jnp.float32),
        "wo2": normal(ks[6], (N_LAYERS, INTERMEDIATE, HIDDEN)),
        "bo2": jnp.zeros((N_LAYERS, 1, HIDDEN), jnp.float32),
        "ln2_g": jnp.ones((N_LAYERS, 1, HIDDEN), jnp.float32),
        "ln2_b": jnp.zeros((N_LAYERS, 1, HIDDEN), jnp.float32),
    }


# --------------------------------- forward ------------------------------------
def report_encoder_forward(params, input_ids, token_type_ids, attention_mask):
    """Returns last_hidden_state, shape (B, S, HIDDEN), float32."""
    b, s = input_ids.shape
    assert s <= MAX_POS

    # Only shape plumbing stays outside the kernel (trivially cheap int
    # reshapes); all gathers / mask arithmetic / encoder math are in-kernel.
    ids2 = input_ids.reshape(b * s, 1).astype(jnp.int32)
    tids2 = token_type_ids.reshape(b * s, 1).astype(jnp.int32)
    mask3 = attention_mask.astype(jnp.int32)[:, None, :]            # (B, 1, S)

    out = pl.pallas_call(
        _make_encoder_kernel(b, s),
        out_shape=jax.ShapeDtypeStruct((b * s, HIDDEN), jnp.float32),
    )(
        ids2, tids2, mask3,
        params["word_emb"], params["pos_emb"], params["type_emb"],
        params["emb_ln_g"], params["emb_ln_b"],
        params["wqkv"], params["bqkv"],
        params["wo"], params["bo"],
        params["ln1_g"], params["ln1_b"],
        params["wi"], params["bi"],
        params["wo2"], params["bo2"],
        params["ln2_g"], params["ln2_b"],
    )
    return out.reshape(b, s, HIDDEN)


# ----------------------------------- main --------------------------------------
if __name__ == "__main__":
    B, S = 2, 8
    key = jax.random.PRNGKey(0)
    k_param, k_ids, k_type = jax.random.split(key, 3)

    params = init_params(k_param)
    input_ids = jax.random.randint(k_ids, (B, S), 0, VOCAB, dtype=jnp.int32)
    token_type_ids = jax.random.randint(k_type, (B, S), 0, TYPE_VOCAB, dtype=jnp.int32)
    # second sequence has its last two tokens padded out
    attention_mask = jnp.array([[1] * S, [1] * (S - 2) + [0, 0]], dtype=jnp.int32)

    fwd = jax.jit(report_encoder_forward)
    out = fwd(params, input_ids, token_type_ids, attention_mask)
    out = jax.block_until_ready(out)

    assert out.shape == (B, S, HIDDEN) and out.dtype == jnp.float32
    assert bool(jnp.all(jnp.isfinite(out)))
    print("KERNEL_OK")
</pallas_src>

<mosaic_0001>
module attributes {stable_mosaic.version = 11 : i64} {
  func.func @encoder_kernel(%arg0: memref<16x1xi32, #tpu.memory_space<vmem>>, %arg1: memref<16x1xi32, #tpu.memory_space<vmem>>, %arg2: memref<2x1x8xi32, #tpu.memory_space<vmem>>, %arg3: memref<50x32xf32, #tpu.memory_space<vmem>>, %arg4: memref<16x32xf32, #tpu.memory_space<vmem>>, %arg5: memref<2x32xf32, #tpu.memory_space<vmem>>, %arg6: memref<1x32xf32, #tpu.memory_space<vmem>>, %arg7: memref<1x32xf32, #tpu.memory_space<vmem>>, %arg8: memref<2x32x96xf32, #tpu.memory_space<vmem>>, %arg9: memref<2x1x96xf32, #tpu.memory_space<vmem>>, %arg10: memref<2x32x32xf32, #tpu.memory_space<vmem>>, %arg11: memref<2x1x32xf32, #tpu.memory_space<vmem>>, %arg12: memref<2x1x32xf32, #tpu.memory_space<vmem>>, %arg13: memref<2x1x32xf32, #tpu.memory_space<vmem>>, %arg14: memref<2x32x64xf32, #tpu.memory_space<vmem>>, %arg15: memref<2x1x64xf32, #tpu.memory_space<vmem>>, %arg16: memref<2x64x32xf32, #tpu.memory_space<vmem>>, %arg17: memref<2x1x32xf32, #tpu.memory_space<vmem>>, %arg18: memref<2x1x32xf32, #tpu.memory_space<vmem>>, %arg19: memref<2x1x32xf32, #tpu.memory_space<vmem>>, %arg20: memref<16x32xf32, #tpu.memory_space<vmem>>) attributes {dimension_semantics = [], scalar_prefetch = 0 : i64, scratch_operands = 0 : i64, tpu.core_type = #tpu.core_type<tc>} {
    %c0 = arith.constant 0 : index
    %c0_0 = arith.constant 0 : index
    %0 = vector.load %arg0[%c0, %c0_0] : memref<16x1xi32, #tpu.memory_space<vmem>>, vector<16x1xi32>
    %1 = tpu.iota {dimensions = array<i32: 1>} : vector<16x50xi32>
    %2 = vector.broadcast %0 : vector<16x1xi32> to vector<16x50xi32>
    %3 = arith.cmpi eq, %1, %2 : vector<16x50xi32>
    %4 = arith.extui %3 : vector<16x50xi1> to vector<16x50xi32>
    %5 = arith.sitofp %4 : vector<16x50xi32> to vector<16x50xf32>
    %c0_1 = arith.constant 0 : index
    %c0_2 = arith.constant 0 : index
    %6 = vector.load %arg3[%c0_1, %c0_2] : memref<50x32xf32, #tpu.memory_space<vmem>>, vector<50x32xf32>
    %cst = arith.constant dense<0.000000e+00> : vector<16x32xf32>
    %7 = tpu.matmul %5, %6, %cst {dimension_numbers = #tpu.dot_dimension_numbers<[1], [0], [0], [1], [0, 0, 1, 1], [], []>} : vector<16x50xf32>, vector<50x32xf32>, vector<16x32xf32> -> vector<16x32xf32>
    %c0_3 = arith.constant 0 : index
    %c0_4 = arith.constant 0 : index
    %8 = vector.load %arg1[%c0_3, %c0_4] : memref<16x1xi32, #tpu.memory_space<vmem>>, vector<16x1xi32>
    %9 = tpu.iota {dimensions = array<i32: 1>} : vector<16x2xi32>
    %10 = vector.broadcast %8 : vector<16x1xi32> to vector<16x2xi32>
    %11 = arith.cmpi eq, %9, %10 : vector<16x2xi32>
    %12 = arith.extui %11 : vector<16x2xi1> to vector<16x2xi32>
    %13 = arith.sitofp %12 : vector<16x2xi32> to vector<16x2xf32>
    %c0_5 = arith.constant 0 : index
    %c0_6 = arith.constant 0 : index
    %14 = vector.load %arg5[%c0_5, %c0_6] : memref<2x32xf32, #tpu.memory_space<vmem>>, vector<2x32xf32>
    %cst_7 = arith.constant dense<0.000000e+00> : vector<16x32xf32>
    %15 = tpu.matmul %13, %14, %cst_7 {dimension_numbers = #tpu.dot_dimension_numbers<[1], [0], [0], [1], [0, 0, 1, 1], [], []>} : vector<16x2xf32>, vector<2x32xf32>, vector<16x32xf32> -> vector<16x32xf32>
    %16 = arith.addf %7, %15 : vector<16x32xf32>
    %c0_8 = arith.constant 0 : index
    %c0_9 = arith.constant 0 : index
    %17 = vector.load %arg4[%c0_8, %c0_9] : memref<16x32xf32, #tpu.memory_space<vmem>>, vector<8x32xf32>
    %18 = tpu.concatenate %17, %17 in 0 : vector<8x32xf32>, vector<8x32xf32> -> vector<16x32xf32>
    %19 = arith.addf %16, %18 : vector<16x32xf32>
    %c0_10 = arith.constant 0 : index
    %c0_11 = arith.constant 0 : index
    %20 = vector.load %arg6[%c0_10, %c0_11] : memref<1x32xf32, #tpu.memory_space<vmem>>, vector<1x32xf32>
    %c0_12 = arith.constant 0 : index
    %c0_13 = arith.constant 0 : index
    %21 = vector.load %arg7[%c0_12, %c0_13] : memref<1x32xf32, #tpu.memory_space<vmem>>, vector<1x32xf32>
    %cst_14 = arith.constant dense<0.000000e+00> : vector<16xf32>
    %22 = vector.multi_reduction <add>, %19, %cst_14 [1] : vector<16x32xf32> to vector<16xf32>
    %23 = vector.shape_cast %22 : vector<16xf32> to vector<16x1xf32>
    %cst_15 = arith.constant 3.200000e+01 : f32
    %24 = vector.broadcast %cst_15 : f32 to vector<16x1xf32>
    %25 = arith.divf %23, %24 : vector<16x1xf32>
    %26 = arith.mulf %19, %19 : vector<16x32xf32>
    %cst_16 = arith.constant dense<0.000000e+00> : vector<16xf32>
    %27 = vector.multi_reduction <add>, %26, %cst_16 [1] : vector<16x32xf32> to vector<16xf32>
    %28 = vector.shape_cast %27 : vector<16xf32> to vector<16x1xf32>
    %cst_17 = arith.constant 3.200000e+01 : f32
    %29 = vector.broadcast %cst_17 : f32 to vector<16x1xf32>
    %30 = arith.divf %28, %29 : vector<16x1xf32>
    %31 = arith.mulf %25, %25 : vector<16x1xf32>
    %32 = arith.subf %30, %31 : vector<16x1xf32>
    %33 = vector.broadcast %25 : vector<16x1xf32> to vector<16x32xf32>
    %34 = arith.subf %19, %33 : vector<16x32xf32>
    %cst_18 = arith.constant 9.99999996E-13 : f32
    %35 = vector.broadcast %cst_18 : f32 to vector<16x1xf32>
    %36 = arith.addf %32, %35 : vector<16x1xf32>
    %37 = math.rsqrt %36 : vector<16x1xf32>
    %38 = vector.broadcast %37 : vector<16x1xf32> to vector<16x32xf32>
    %39 = arith.mulf %34, %38 : vector<16x32xf32>
    %40 = vector.broadcast %20 : vector<1x32xf32> to vector<16x32xf32>
    %41 = arith.mulf %39, %40 : vector<16x32xf32>
    %42 = vector.broadcast %21 : vector<1x32xf32> to vector<16x32xf32>
    %43 = arith.addf %41, %42 : vector<16x32xf32>
    %c0_19 = arith.constant 0 : index
    %c0_20 = arith.constant 0 : index
    %c0_21 = arith.constant 0 : index
    %44 = vector.load %arg2[%c0_19, %c0_20, %c0_21] : memref<2x1x8xi32, #tpu.memory_space<vmem>>, vector<2x1x8xi32>
    %45 = arith.sitofp %44 : vector<2x1x8xi32> to vector<2x1x8xf32>
    %cst_22 = arith.constant 1.000000e+00 : f32
    %46 = vector.broadcast %cst_22 : f32 to vector<2x1x8xf32>
    %47 = arith.subf %46, %45 : vector<2x1x8xf32>
    %cst_23 = arith.constant -1.000000e+04 : f32
    %48 = vector.broadcast %cst_23 : f32 to vector<2x1x8xf32>
    %49 = arith.mulf %47, %48 : vector<2x1x8xf32>
    %50 = tpu.concatenate %49, %49, %49, %49 in 0 : vector<2x1x8xf32>, vector<2x1x8xf32>, vector<2x1x8xf32>, vector<2x1x8xf32> -> vector<8x1x8xf32>
    %c0_24 = arith.constant 0 : index
    %c0_25 = arith.constant 0 : index
    %c0_26 = arith.constant 0 : index
    %51 = vector.load %arg8[%c0_24, %c0_25, %c0_26] : memref<2x32x96xf32, #tpu.memory_space<vmem>>, vector<1x32x96xf32>
    %52 = vector.shape_cast %51 : vector<1x32x96xf32> to vector<32x96xf32>
    %cst_27 = arith.constant dense<0.000000e+00> : vector<16x96xf32>
    %53 = tpu.matmul %43, %52, %cst_27 {dimension_numbers = #tpu.dot_dimension_numbers<[1], [0], [0], [1], [0, 0, 1, 1], [], []>} : vector<16x32xf32>, vector<32x96xf32>, vector<16x96xf32> -> vector<16x96xf32>
    %c0_28 = arith.constant 0 : index
    %c0_29 = arith.constant 0 : index
    %c0_30 = arith.constant 0 : index
    %54 = vector.load %arg9[%c0_28, %c0_29, %c0_30] : memref<2x1x96xf32, #tpu.memory_space<vmem>>, vector<1x1x96xf32>
    %55 = vector.shape_cast %54 : vector<1x1x96xf32> to vector<1x96xf32>
    %56 = vector.broadcast %55 : vector<1x96xf32> to vector<16x96xf32>
    %57 = arith.addf %53, %56 : vector<16x96xf32>
    %58 = vector.extract_strided_slice %57 {offsets = [0, 0], sizes = [16, 32], strides = [1, 1]} : vector<16x96xf32> to vector<16x32xf32>
    %59 = vector.extract_strided_slice %58 {offsets = [0, 0], sizes = [16, 8], strides = [1, 1]} : vector<16x32xf32> to vector<16x8xf32>
    %60 = vector.shape_cast %59 : vector<16x8xf32> to vector<2x8x8xf32>
    %61 = vector.extract_strided_slice %58 {offsets = [0, 8], sizes = [16, 8], strides = [1, 1]} : vector<16x32xf32> to vector<16x8xf32>
    %62 = vector.shape_cast %61 : vector<16x8xf32> to vector<2x8x8xf32>
    %63 = vector.extract_strided_slice %58 {offsets = [0, 16], sizes = [16, 8], strides = [1, 1]} : vector<16x32xf32> to vector<16x8xf32>
    %64 = vector.shape_cast %63 : vector<16x8xf32> to vector<2x8x8xf32>
    %65 = vector.extract_strided_slice %58 {offsets = [0, 24], sizes = [16, 8], strides = [1, 1]} : vector<16x32xf32> to vector<16x8xf32>
    %66 = vector.shape_cast %65 : vector<16x8xf32> to vector<2x8x8xf32>
    %67 = tpu.concatenate %60, %62, %64, %66 in 0 : vector<2x8x8xf32>, vector<2x8x8xf32>, vector<2x8x8xf32>, vector<2x8x8xf32> -> vector<8x8x8xf32>
    %68 = vector.extract_strided_slice %57 {offsets = [0, 32], sizes = [16, 32], strides = [1, 1]} : vector<16x96xf32> to vector<16x32xf32>
    %69 = vector.extract_strided_slice %68 {offsets = [0, 0], sizes = [16, 8], strides = [1, 1]} : vector<16x32xf32> to vector<16x8xf32>
    %70 = vector.shape_cast %69 : vector<16x8xf32> to vector<2x8x8xf32>
    %71 = vector.extract_strided_slice %68 {offsets = [0, 8], sizes = [16, 8], strides = [1, 1]} : vector<16x32xf32> to vector<16x8xf32>
    %72 = vector.shape_cast %71 : vector<16x8xf32> to vector<2x8x8xf32>
    %73 = vector.extract_strided_slice %68 {offsets = [0, 16], sizes = [16, 8], strides = [1, 1]} : vector<16x32xf32> to vector<16x8xf32>
    %74 = vector.shape_cast %73 : vector<16x8xf32> to vector<2x8x8xf32>
    %75 = vector.extract_strided_slice %68 {offsets = [0, 24], sizes = [16, 8], strides = [1, 1]} : vector<16x32xf32> to vector<16x8xf32>
    %76 = vector.shape_cast %75 : vector<16x8xf32> to vector<2x8x8xf32>
    %77 = tpu.concatenate %70, %72, %74, %76 in 0 : vector<2x8x8xf32>, vector<2x8x8xf32>, vector<2x8x8xf32>, vector<2x8x8xf32> -> vector<8x8x8xf32>
    %78 = vector.extract_strided_slice %57 {offsets = [0, 64], sizes = [16, 32], strides = [1, 1]} : vector<16x96xf32> to vector<16x32xf32>
    %79 = vector.extract_strided_slice %78 {offsets = [0, 0], sizes = [16, 8], strides = [1, 1]} : vector<16x32xf32> to vector<16x8xf32>
    %80 = vector.shape_cast %79 : vector<16x8xf32> to vector<2x8x8xf32>
    %81 = vector.extract_strided_slice %78 {offsets = [0, 8], sizes = [16, 8], strides = [1, 1]} : vector<16x32xf32> to vector<16x8xf32>
    %82 = vector.shape_cast %81 : vector<16x8xf32> to vector<2x8x8xf32>
    %83 = vector.extract_strided_slice %78 {offsets = [0, 16], sizes = [16, 8], strides = [1, 1]} : vector<16x32xf32> to vector<16x8xf32>
    %84 = vector.shape_cast %83 : vector<16x8xf32> to vector<2x8x8xf32>
    %85 = vector.extract_strided_slice %78 {offsets = [0, 24], sizes = [16, 8], strides = [1, 1]} : vector<16x32xf32> to vector<16x8xf32>
    %86 = vector.shape_cast %85 : vector<16x8xf32> to vector<2x8x8xf32>
    %87 = tpu.concatenate %80, %82, %84, %86 in 0 : vector<2x8x8xf32>, vector<2x8x8xf32>, vector<2x8x8xf32>, vector<2x8x8xf32> -> vector<8x8x8xf32>
    "tpu.trace_start"() <{level = 10 : i32, message = "bqd,bkd->bqk"}> : () -> ()
    %cst_31 = arith.constant dense<0.000000e+00> : vector<8x8x8xf32>
    %88 = tpu.matmul %67, %77, %cst_31 {dimension_numbers = #tpu.dot_dimension_numbers<[2], [2], [1], [1], [0, 0, 0, 1, 1, 1], [0], [0]>} : vector<8x8x8xf32>, vector<8x8x8xf32>, vector<8x8x8xf32> -> vector<8x8x8xf32>
    "tpu.trace_stop"() : () -> ()
    %cst_32 = arith.constant 0.353553385 : f32
    %89 = vector.broadcast %cst_32 : f32 to vector<8x8x8xf32>
    %90 = arith.mulf %88, %89 : vector<8x8x8xf32>
    %91 = vector.broadcast %50 : vector<8x1x8xf32> to vector<8x8x8xf32>
    %92 = arith.addf %90, %91 : vector<8x8x8xf32>
    %cst_33 = arith.constant dense<0xFF800000> : vector<8x8xf32>
    %93 = vector.multi_reduction <maximumf>, %92, %cst_33 [2] : vector<8x8x8xf32> to vector<8x8xf32>
    %94 = vector.shape_cast %93 : vector<8x8xf32> to vector<8x8x1xf32>
    %95 = vector.broadcast %94 : vector<8x8x1xf32> to vector<8x8x8xf32>
    %96 = arith.subf %92, %95 : vector<8x8x8xf32>
    %97 = math.exp %96 : vector<8x8x8xf32>
    %cst_34 = arith.constant dense<0.000000e+00> : vector<8x8xf32>
    %98 = vector.multi_reduction <add>, %97, %cst_34 [2] : vector<8x8x8xf32> to vector<8x8xf32>
    %99 = vector.shape_cast %98 : vector<8x8xf32> to vector<8x8x1xf32>
    %100 = tpu.reciprocal %99 {approx = true} : vector<8x8x1xf32> -> vector<8x8x1xf32>
    %101 = vector.broadcast %100 : vector<8x8x1xf32> to vector<8x8x8xf32>
    %102 = arith.mulf %97, %101 : vector<8x8x8xf32>
    "tpu.trace_start"() <{level = 10 : i32, message = "bqk,bkd->bqd"}> : () -> ()
    %cst_35 = arith.constant dense<0.000000e+00> : vector<8x8x8xf32>
    %103 = tpu.matmul %102, %87, %cst_35 {dimension_numbers = #tpu.dot_dimension_numbers<[2], [1], [1], [2], [0, 0, 0, 1, 1, 2], [0], [0]>} : vector<8x8x8xf32>, vector<8x8x8xf32>, vector<8x8x8xf32> -> vector<8x8x8xf32>
    "tpu.trace_stop"() : () -> ()
    %104 = vector.extract_strided_slice %103 {offsets = [0, 0, 0], sizes = [2, 8, 8], strides = [1, 1, 1]} : vector<8x8x8xf32> to vector<2x8x8xf32>
    %105 = vector.shape_cast %104 : vector<2x8x8xf32> to vector<16x8xf32>
    %106 = vector.extract_strided_slice %103 {offsets = [2, 0, 0], sizes = [2, 8, 8], strides = [1, 1, 1]} : vector<8x8x8xf32> to vector<2x8x8xf32>
    %107 = vector.shape_cast %106 : vector<2x8x8xf32> to vector<16x8xf32>
    %108 = vector.extract_strided_slice %103 {offsets = [4, 0, 0], sizes = [2, 8, 8], strides = [1, 1, 1]} : vector<8x8x8xf32> to vector<2x8x8xf32>
    %109 = vector.shape_cast %108 : vector<2x8x8xf32> to vector<16x8xf32>
    %110 = vector.extract_strided_slice %103 {offsets = [6, 0, 0], sizes = [2, 8, 8], strides = [1, 1, 1]} : vector<8x8x8xf32> to vector<2x8x8xf32>
    %111 = vector.shape_cast %110 : vector<2x8x8xf32> to vector<16x8xf32>
    %112 = tpu.concatenate %105, %107, %109, %111 in 1 : vector<16x8xf32>, vector<16x8xf32>, vector<16x8xf32>, vector<16x8xf32> -> vector<16x32xf32>
    %c0_36 = arith.constant 0 : index
    %c0_37 = arith.constant 0 : index
    %c0_38 = arith.constant 0 : index
    %113 = vector.load %arg10[%c0_36, %c0_37, %c0_38] : memref<2x32x32xf32, #tpu.memory_space<vmem>>, vector<1x32x32xf32>
    %114 = vector.shape_cast %113 : vector<1x32x32xf32> to vector<32x32xf32>
    %cst_39 = arith.constant dense<0.000000e+00> : vector<16x32xf32>
    %115 = tpu.matmul %112, %114, %cst_39 {dimension_numbers = #tpu.dot_dimension_numbers<[1], [0], [0], [1], [0, 0, 1, 1], [], []>} : vector<16x32xf32>, vector<32x32xf32>, vector<16x32xf32> -> vector<16x32xf32>
    %c0_40 = arith.constant 0 : index
    %c0_41 = arith.constant 0 : index
    %c0_42 = arith.constant 0 : index
    %116 = vector.load %arg11[%c0_40, %c0_41, %c0_42] : memref<2x1x32xf32, #tpu.memory_space<vmem>>, vector<1x1x32xf32>
    %117 = vector.shape_cast %116 : vector<1x1x32xf32> to vector<1x32xf32>
    %118 = vector.broadcast %117 : vector<1x32xf32> to vector<16x32xf32>
    %119 = arith.addf %115, %118 : vector<16x32xf32>
    %120 = arith.addf %119, %43 : vector<16x32xf32>
    %c0_43 = arith.constant 0 : index
    %c0_44 = arith.constant 0 : index
    %c0_45 = arith.constant 0 : index
    %121 = vector.load %arg12[%c0_43, %c0_44, %c0_45] : memref<2x1x32xf32, #tpu.memory_space<vmem>>, vector<1x1x32xf32>
    %122 = vector.shape_cast %121 : vector<1x1x32xf32> to vector<1x32xf32>
    %c0_46 = arith.constant 0 : index
    %c0_47 = arith.constant 0 : index
    %c0_48 = arith.constant 0 : index
    %123 = vector.load %arg13[%c0_46, %c0_47, %c0_48] : memref<2x1x32xf32, #tpu.memory_space<vmem>>, vector<1x1x32xf32>
    %124 = vector.shape_cast %123 : vector<1x1x32xf32> to vector<1x32xf32>
    %cst_49 = arith.constant dense<0.000000e+00> : vector<16xf32>
    %125 = vector.multi_reduction <add>, %120, %cst_49 [1] : vector<16x32xf32> to vector<16xf32>
    %126 = vector.shape_cast %125 : vector<16xf32> to vector<16x1xf32>
    %cst_50 = arith.constant 3.200000e+01 : f32
    %127 = vector.broadcast %cst_50 : f32 to vector<16x1xf32>
    %128 = arith.divf %126, %127 : vector<16x1xf32>
    %129 = arith.mulf %120, %120 : vector<16x32xf32>
    %cst_51 = arith.constant dense<0.000000e+00> : vector<16xf32>
    %130 = vector.multi_reduction <add>, %129, %cst_51 [1] : vector<16x32xf32> to vector<16xf32>
    %131 = vector.shape_cast %130 : vector<16xf32> to vector<16x1xf32>
    %cst_52 = arith.constant 3.200000e+01 : f32
    %132 = vector.broadcast %cst_52 : f32 to vector<16x1xf32>
    %133 = arith.divf %131, %132 : vector<16x1xf32>
    %134 = arith.mulf %128, %128 : vector<16x1xf32>
    %135 = arith.subf %133, %134 : vector<16x1xf32>
    %136 = vector.broadcast %128 : vector<16x1xf32> to vector<16x32xf32>
    %137 = arith.subf %120, %136 : vector<16x32xf32>
    %cst_53 = arith.constant 9.99999996E-13 : f32
    %138 = vector.broadcast %cst_53 : f32 to vector<16x1xf32>
    %139 = arith.addf %135, %138 : vector<16x1xf32>
    %140 = math.rsqrt %139 : vector<16x1xf32>
    %141 = vector.broadcast %140 : vector<16x1xf32> to vector<16x32xf32>
    %142 = arith.mulf %137, %141 : vector<16x32xf32>
    %143 = vector.broadcast %122 : vector<1x32xf32> to vector<16x32xf32>
    %144 = arith.mulf %142, %143 : vector<16x32xf32>
    %145 = vector.broadcast %124 : vector<1x32xf32> to vector<16x32xf32>
    %146 = arith.addf %144, %145 : vector<16x32xf32>
    %c0_54 = arith.constant 0 : index
    %c0_55 = arith.constant 0 : index
    %c0_56 = arith.constant 0 : index
    %147 = vector.load %arg14[%c0_54, %c0_55, %c0_56] : memref<2x32x64xf32, #tpu.memory_space<vmem>>, vector<1x32x64xf32>
    %148 = vector.shape_cast %147 : vector<1x32x64xf32> to vector<32x64xf32>
    %cst_57 = arith.constant dense<0.000000e+00> : vector<16x64xf32>
    %149 = tpu.matmul %146, %148, %cst_57 {dimension_numbers = #tpu.dot_dimension_numbers<[1], [0], [0], [1], [0, 0, 1, 1], [], []>} : vector<16x32xf32>, vector<32x64xf32>, vector<16x64xf32> -> vector<16x64xf32>
    %c0_58 = arith.constant 0 : index
    %c0_59 = arith.constant 0 : index
    %c0_60 = arith.constant 0 : index
    %150 = vector.load %arg15[%c0_58, %c0_59, %c0_60] : memref<2x1x64xf32, #tpu.memory_space<vmem>>, vector<1x1x64xf32>
    %151 = vector.shape_cast %150 : vector<1x1x64xf32> to vector<1x64xf32>
    %152 = vector.broadcast %151 : vector<1x64xf32> to vector<16x64xf32>
    %153 = arith.addf %149, %152 : vector<16x64xf32>
    %cst_61 = arith.constant 5.000000e-01 : f32
    %154 = vector.broadcast %cst_61 : f32 to vector<16x64xf32>
    %155 = arith.mulf %154, %153 : vector<16x64xf32>
    %cst_62 = arith.constant 4.471500e-02 : f32
    %156 = vector.broadcast %cst_62 : f32 to vector<16x64xf32>
    %157 = arith.mulf %156, %153 : vector<16x64xf32>
    %158 = arith.mulf %157, %153 : vector<16x64xf32>
    %159 = arith.mulf %158, %153 : vector<16x64xf32>
    %160 = arith.addf %153, %159 : vector<16x64xf32>
    %cst_63 = arith.constant 0.797884583 : f32
    %161 = vector.broadcast %cst_63 : f32 to vector<16x64xf32>
    %162 = arith.mulf %161, %160 : vector<16x64xf32>
    %163 = math.tanh %162 : vector<16x64xf32>
    %cst_64 = arith.constant 1.000000e+00 : f32
    %164 = vector.broadcast %cst_64 : f32 to vector<16x64xf32>
    %165 = arith.addf %164, %163 : vector<16x64xf32>
    %166 = arith.mulf %155, %165 : vector<16x64xf32>
    %c0_65 = arith.constant 0 : index
    %c0_66 = arith.constant 0 : index
    %c0_67 = arith.constant 0 : index
    %167 = vector.load %arg16[%c0_65, %c0_66, %c0_67] : memref<2x64x32xf32, #tpu.memory_space<vmem>>, vector<1x64x32xf32>
    %168 = vector.shape_cast %167 : vector<1x64x32xf32> to vector<64x32xf32>
    %cst_68 = arith.constant dense<0.000000e+00> : vector<16x32xf32>
    %169 = tpu.matmul %166, %168, %cst_68 {dimension_numbers = #tpu.dot_dimension_numbers<[1], [0], [0], [1], [0, 0, 1, 1], [], []>} : vector<16x64xf32>, vector<64x32xf32>, vector<16x32xf32> -> vector<16x32xf32>
    %c0_69 = arith.constant 0 : index
    %c0_70 = arith.constant 0 : index
    %c0_71 = arith.constant 0 : index
    %170 = vector.load %arg17[%c0_69, %c0_70, %c0_71] : memref<2x1x32xf32, #tpu.memory_space<vmem>>, vector<1x1x32xf32>
    %171 = vector.shape_cast %170 : vector<1x1x32xf32> to vector<1x32xf32>
    %172 = vector.broadcast %171 : vector<1x32xf32> to vector<16x32xf32>
    %173 = arith.addf %169, %172 : vector<16x32xf32>
    %174 = arith.addf %173, %146 : vector<16x32xf32>
    %c0_72 = arith.constant 0 : index
    %c0_73 = arith.constant 0 : index
    %c0_74 = arith.constant 0 : index
    %175 = vector.load %arg18[%c0_72, %c0_73, %c0_74] : memref<2x1x32xf32, #tpu.memory_space<vmem>>, vector<1x1x32xf32>
    %176 = vector.shape_cast %175 : vector<1x1x32xf32> to vector<1x32xf32>
    %c0_75 = arith.constant 0 : index
    %c0_76 = arith.constant 0 : index
    %c0_77 = arith.constant 0 : index
    %177 = vector.load %arg19[%c0_75, %c0_76, %c0_77] : memref<2x1x32xf32, #tpu.memory_space<vmem>>, vector<1x1x32xf32>
    %178 = vector.shape_cast %177 : vector<1x1x32xf32> to vector<1x32xf32>
    %cst_78 = arith.constant dense<0.000000e+00> : vector<16xf32>
    %179 = vector.multi_reduction <add>, %174, %cst_78 [1] : vector<16x32xf32> to vector<16xf32>
    %180 = vector.shape_cast %179 : vector<16xf32> to vector<16x1xf32>
    %cst_79 = arith.constant 3.200000e+01 : f32
    %181 = vector.broadcast %cst_79 : f32 to vector<16x1xf32>
    %182 = arith.divf %180, %181 : vector<16x1xf32>
    %183 = arith.mulf %174, %174 : vector<16x32xf32>
    %cst_80 = arith.constant dense<0.000000e+00> : vector<16xf32>
    %184 = vector.multi_reduction <add>, %183, %cst_80 [1] : vector<16x32xf32> to vector<16xf32>
    %185 = vector.shape_cast %184 : vector<16xf32> to vector<16x1xf32>
    %cst_81 = arith.constant 3.200000e+01 : f32
    %186 = vector.broadcast %cst_81 : f32 to vector<16x1xf32>
    %187 = arith.divf %185, %186 : vector<16x1xf32>
    %188 = arith.mulf %182, %182 : vector<16x1xf32>
    %189 = arith.subf %187, %188 : vector<16x1xf32>
    %190 = vector.broadcast %182 : vector<16x1xf32> to vector<16x32xf32>
    %191 = arith.subf %174, %190 : vector<16x32xf32>
    %cst_82 = arith.constant 9.99999996E-13 : f32
    %192 = vector.broadcast %cst_82 : f32 to vector<16x1xf32>
    %193 = arith.addf %189, %192 : vector<16x1xf32>
    %194 = math.rsqrt %193 : vector<16x1xf32>
    %195 = vector.broadcast %194 : vector<16x1xf32> to vector<16x32xf32>
    %196 = arith.mulf %191, %195 : vector<16x32xf32>
    %197 = vector.broadcast %176 : vector<1x32xf32> to vector<16x32xf32>
    %198 = arith.mulf %196, %197 : vector<16x32xf32>
    %199 = vector.broadcast %178 : vector<1x32xf32> to vector<16x32xf32>
    %200 = arith.addf %198, %199 : vector<16x32xf32>
    %c1 = arith.constant 1 : index
    %c0_83 = arith.constant 0 : index
    %c0_84 = arith.constant 0 : index
    %201 = vector.load %arg8[%c1, %c0_83, %c0_84] : memref<2x32x96xf32, #tpu.memory_space<vmem>>, vector<1x32x96xf32>
    %202 = vector.shape_cast %201 : vector<1x32x96xf32> to vector<32x96xf32>
    %cst_85 = arith.constant dense<0.000000e+00> : vector<16x96xf32>
    %203 = tpu.matmul %200, %202, %cst_85 {dimension_numbers = #tpu.dot_dimension_numbers<[1], [0], [0], [1], [0, 0, 1, 1], [], []>} : vector<16x32xf32>, vector<32x96xf32>, vector<16x96xf32> -> vector<16x96xf32>
    %c1_86 = arith.constant 1 : index
    %c0_87 = arith.constant 0 : index
    %c0_88 = arith.constant 0 : index
    %204 = vector.load %arg9[%c1_86, %c0_87, %c0_88] : memref<2x1x96xf32, #tpu.memory_space<vmem>>, vector<1x1x96xf32>
    %205 = vector.shape_cast %204 : vector<1x1x96xf32> to vector<1x96xf32>
    %206 = vector.broadcast %205 : vector<1x96xf32> to vector<16x96xf32>
    %207 = arith.addf %203, %206 : vector<16x96xf32>
    %208 = vector.extract_strided_slice %207 {offsets = [0, 0], sizes = [16, 32], strides = [1, 1]} : vector<16x96xf32> to vector<16x32xf32>
    %209 = vector.extract_strided_slice %208 {offsets = [0, 0], sizes = [16, 8], strides = [1, 1]} : vector<16x32xf32> to vector<16x8xf32>
    %210 = vector.shape_cast %209 : vector<16x8xf32> to vector<2x8x8xf32>
    %211 = vector.extract_strided_slice %208 {offsets = [0, 8], sizes = [16, 8], strides = [1, 1]} : vector<16x32xf32> to vector<16x8xf32>
    %212 = vector.shape_cast %211 : vector<16x8xf32> to vector<2x8x8xf32>
    %213 = vector.extract_strided_slice %208 {offsets = [0, 16], sizes = [16, 8], strides = [1, 1]} : vector<16x32xf32> to vector<16x8xf32>
    %214 = vector.shape_cast %213 : vector<16x8xf32> to vector<2x8x8xf32>
    %215 = vector.extract_strided_slice %208 {offsets = [0, 24], sizes = [16, 8], strides = [1, 1]} : vector<16x32xf32> to vector<16x8xf32>
    %216 = vector.shape_cast %215 : vector<16x8xf32> to vector<2x8x8xf32>
    %217 = tpu.concatenate %210, %212, %214, %216 in 0 : vector<2x8x8xf32>, vector<2x8x8xf32>, vector<2x8x8xf32>, vector<2x8x8xf32> -> vector<8x8x8xf32>
    %218 = vector.extract_strided_slice %207 {offsets = [0, 32], sizes = [16, 32], strides = [1, 1]} : vector<16x96xf32> to vector<16x32xf32>
    %219 = vector.extract_strided_slice %218 {offsets = [0, 0], sizes = [16, 8], strides = [1, 1]} : vector<16x32xf32> to vector<16x8xf32>
    %220 = vector.shape_cast %219 : vector<16x8xf32> to vector<2x8x8xf32>
    %221 = vector.extract_strided_slice %218 {offsets = [0, 8], sizes = [16, 8], strides = [1, 1]} : vector<16x32xf32> to vector<16x8xf32>
    %222 = vector.shape_cast %221 : vector<16x8xf32> to vector<2x8x8xf32>
    %223 = vector.extract_strided_slice %218 {offsets = [0, 16], sizes = [16, 8], strides = [1, 1]} : vector<16x32xf32> to vector<16x8xf32>
    %224 = vector.shape_cast %223 : vector<16x8xf32> to vector<2x8x8xf32>
    %225 = vector.extract_strided_slice %218 {offsets = [0, 24], sizes = [16, 8], strides = [1, 1]} : vector<16x32xf32> to vector<16x8xf32>
    %226 = vector.shape_cast %225 : vector<16x8xf32> to vector<2x8x8xf32>
    %227 = tpu.concatenate %220, %222, %224, %226 in 0 : vector<2x8x8xf32>, vector<2x8x8xf32>, vector<2x8x8xf32>, vector<2x8x8xf32> -> vector<8x8x8xf32>
    %228 = vector.extract_strided_slice %207 {offsets = [0, 64], sizes = [16, 32], strides = [1, 1]} : vector<16x96xf32> to vector<16x32xf32>
    %229 = vector.extract_strided_slice %228 {offsets = [0, 0], sizes = [16, 8], strides = [1, 1]} : vector<16x32xf32> to vector<16x8xf32>
    %230 = vector.shape_cast %229 : vector<16x8xf32> to vector<2x8x8xf32>
    %231 = vector.extract_strided_slice %228 {offsets = [0, 8], sizes = [16, 8], strides = [1, 1]} : vector<16x32xf32> to vector<16x8xf32>
    %232 = vector.shape_cast %231 : vector<16x8xf32> to vector<2x8x8xf32>
    %233 = vector.extract_strided_slice %228 {offsets = [0, 16], sizes = [16, 8], strides = [1, 1]} : vector<16x32xf32> to vector<16x8xf32>
    %234 = vector.shape_cast %233 : vector<16x8xf32> to vector<2x8x8xf32>
    %235 = vector.extract_strided_slice %228 {offsets = [0, 24], sizes = [16, 8], strides = [1, 1]} : vector<16x32xf32> to vector<16x8xf32>
    %236 = vector.shape_cast %235 : vector<16x8xf32> to vector<2x8x8xf32>
    %237 = tpu.concatenate %230, %232, %234, %236 in 0 : vector<2x8x8xf32>, vector<2x8x8xf32>, vector<2x8x8xf32>, vector<2x8x8xf32> -> vector<8x8x8xf32>
    "tpu.trace_start"() <{level = 10 : i32, message = "bqd,bkd->bqk"}> : () -> ()
    %cst_89 = arith.constant dense<0.000000e+00> : vector<8x8x8xf32>
    %238 = tpu.matmul %217, %227, %cst_89 {dimension_numbers = #tpu.dot_dimension_numbers<[2], [2], [1], [1], [0, 0, 0, 1, 1, 1], [0], [0]>} : vector<8x8x8xf32>, vector<8x8x8xf32>, vector<8x8x8xf32> -> vector<8x8x8xf32>
    "tpu.trace_stop"() : () -> ()
    %cst_90 = arith.constant 0.353553385 : f32
    %239 = vector.broadcast %cst_90 : f32 to vector<8x8x8xf32>
    %240 = arith.mulf %238, %239 : vector<8x8x8xf32>
    %241 = vector.broadcast %50 : vector<8x1x8xf32> to vector<8x8x8xf32>
    %242 = arith.addf %240, %241 : vector<8x8x8xf32>
    %cst_91 = arith.constant dense<0xFF800000> : vector<8x8xf32>
    %243 = vector.multi_reduction <maximumf>, %242, %cst_91 [2] : vector<8x8x8xf32> to vector<8x8xf32>
    %244 = vector.shape_cast %243 : vector<8x8xf32> to vector<8x8x1xf32>
    %245 = vector.broadcast %244 : vector<8x8x1xf32> to vector<8x8x8xf32>
    %246 = arith.subf %242, %245 : vector<8x8x8xf32>
    %247 = math.exp %246 : vector<8x8x8xf32>
    %cst_92 = arith.constant dense<0.000000e+00> : vector<8x8xf32>
    %248 = vector.multi_reduction <add>, %247, %cst_92 [2] : vector<8x8x8xf32> to vector<8x8xf32>
    %249 = vector.shape_cast %248 : vector<8x8xf32> to vector<8x8x1xf32>
    %250 = tpu.reciprocal %249 {approx = true} : vector<8x8x1xf32> -> vector<8x8x1xf32>
    %251 = vector.broadcast %250 : vector<8x8x1xf32> to vector<8x8x8xf32>
    %252 = arith.mulf %247, %251 : vector<8x8x8xf32>
    "tpu.trace_start"() <{level = 10 : i32, message = "bqk,bkd->bqd"}> : () -> ()
    %cst_93 = arith.constant dense<0.000000e+00> : vector<8x8x8xf32>
    %253 = tpu.matmul %252, %237, %cst_93 {dimension_numbers = #tpu.dot_dimension_numbers<[2], [1], [1], [2], [0, 0, 0, 1, 1, 2], [0], [0]>} : vector<8x8x8xf32>, vector<8x8x8xf32>, vector<8x8x8xf32> -> vector<8x8x8xf32>
    "tpu.trace_stop"() : () -> ()
    %254 = vector.extract_strided_slice %253 {offsets = [0, 0, 0], sizes = [2, 8, 8], strides = [1, 1, 1]} : vector<8x8x8xf32> to vector<2x8x8xf32>
    %255 = vector.shape_cast %254 : vector<2x8x8xf32> to vector<16x8xf32>
    %256 = vector.extract_strided_slice %253 {offsets = [2, 0, 0], sizes = [2, 8, 8], strides = [1, 1, 1]} : vector<8x8x8xf32> to vector<2x8x8xf32>
    %257 = vector.shape_cast %256 : vector<2x8x8xf32> to vector<16x8xf32>
    %258 = vector.extract_strided_slice %253 {offsets = [4, 0, 0], sizes = [2, 8, 8], strides = [1, 1, 1]} : vector<8x8x8xf32> to vector<2x8x8xf32>
    %259 = vector.shape_cast %258 : vector<2x8x8xf32> to vector<16x8xf32>
    %260 = vector.extract_strided_slice %253 {offsets = [6, 0, 0], sizes = [2, 8, 8], strides = [1, 1, 1]} : vector<8x8x8xf32> to vector<2x8x8xf32>
    %261 = vector.shape_cast %260 : vector<2x8x8xf32> to vector<16x8xf32>
    %262 = tpu.concatenate %255, %257, %259, %261 in 1 : vector<16x8xf32>, vector<16x8xf32>, vector<16x8xf32>, vector<16x8xf32> -> vector<16x32xf32>
    %c1_94 = arith.constant 1 : index
    %c0_95 = arith.constant 0 : index
    %c0_96 = arith.constant 0 : index
    %263 = vector.load %arg10[%c1_94, %c0_95, %c0_96] : memref<2x32x32xf32, #tpu.memory_space<vmem>>, vector<1x32x32xf32>
    %264 = vector.shape_cast %263 : vector<1x32x32xf32> to vector<32x32xf32>
    %cst_97 = arith.constant dense<0.000000e+00> : vector<16x32xf32>
    %265 = tpu.matmul %262, %264, %cst_97 {dimension_numbers = #tpu.dot_dimension_numbers<[1], [0], [0], [1], [0, 0, 1, 1], [], []>} : vector<16x32xf32>, vector<32x32xf32>, vector<16x32xf32> -> vector<16x32xf32>
    %c1_98 = arith.constant 1 : index
    %c0_99 = arith.constant 0 : index
    %c0_100 = arith.constant 0 : index
    %266 = vector.load %arg11[%c1_98, %c0_99, %c0_100] : memref<2x1x32xf32, #tpu.memory_space<vmem>>, vector<1x1x32xf32>
    %267 = vector.shape_cast %266 : vector<1x1x32xf32> to vector<1x32xf32>
    %268 = vector.broadcast %267 : vector<1x32xf32> to vector<16x32xf32>
    %269 = arith.addf %265, %268 : vector<16x32xf32>
    %270 = arith.addf %269, %200 : vector<16x32xf32>
    %c1_101 = arith.constant 1 : index
    %c0_102 = arith.constant 0 : index
    %c0_103 = arith.constant 0 : index
    %271 = vector.load %arg12[%c1_101, %c0_102, %c0_103] : memref<2x1x32xf32, #tpu.memory_space<vmem>>, vector<1x1x32xf32>
    %272 = vector.shape_cast %271 : vector<1x1x32xf32> to vector<1x32xf32>
    %c1_104 = arith.constant 1 : index
    %c0_105 = arith.constant 0 : index
    %c0_106 = arith.constant 0 : index
    %273 = vector.load %arg13[%c1_104, %c0_105, %c0_106] : memref<2x1x32xf32, #tpu.memory_space<vmem>>, vector<1x1x32xf32>
    %274 = vector.shape_cast %273 : vector<1x1x32xf32> to vector<1x32xf32>
    %cst_107 = arith.constant dense<0.000000e+00> : vector<16xf32>
    %275 = vector.multi_reduction <add>, %270, %cst_107 [1] : vector<16x32xf32> to vector<16xf32>
    %276 = vector.shape_cast %275 : vector<16xf32> to vector<16x1xf32>
    %cst_108 = arith.constant 3.200000e+01 : f32
    %277 = vector.broadcast %cst_108 : f32 to vector<16x1xf32>
    %278 = arith.divf %276, %277 : vector<16x1xf32>
    %279 = arith.mulf %270, %270 : vector<16x32xf32>
    %cst_109 = arith.constant dense<0.000000e+00> : vector<16xf32>
    %280 = vector.multi_reduction <add>, %279, %cst_109 [1] : vector<16x32xf32> to vector<16xf32>
    %281 = vector.shape_cast %280 : vector<16xf32> to vector<16x1xf32>
    %cst_110 = arith.constant 3.200000e+01 : f32
    %282 = vector.broadcast %cst_110 : f32 to vector<16x1xf32>
    %283 = arith.divf %281, %282 : vector<16x1xf32>
    %284 = arith.mulf %278, %278 : vector<16x1xf32>
    %285 = arith.subf %283, %284 : vector<16x1xf32>
    %286 = vector.broadcast %278 : vector<16x1xf32> to vector<16x32xf32>
    %287 = arith.subf %270, %286 : vector<16x32xf32>
    %cst_111 = arith.constant 9.99999996E-13 : f32
    %288 = vector.broadcast %cst_111 : f32 to vector<16x1xf32>
    %289 = arith.addf %285, %288 : vector<16x1xf32>
    %290 = math.rsqrt %289 : vector<16x1xf32>
    %291 = vector.broadcast %290 : vector<16x1xf32> to vector<16x32xf32>
    %292 = arith.mulf %287, %291 : vector<16x32xf32>
    %293 = vector.broadcast %272 : vector<1x32xf32> to vector<16x32xf32>
    %294 = arith.mulf %292, %293 : vector<16x32xf32>
    %295 = vector.broadcast %274 : vector<1x32xf32> to vector<16x32xf32>
    %296 = arith.addf %294, %295 : vector<16x32xf32>
    %c1_112 = arith.constant 1 : index
    %c0_113 = arith.constant 0 : index
    %c0_114 = arith.constant 0 : index
    %297 = vector.load %arg14[%c1_112, %c0_113, %c0_114] : memref<2x32x64xf32, #tpu.memory_space<vmem>>, vector<1x32x64xf32>
    %298 = vector.shape_cast %297 : vector<1x32x64xf32> to vector<32x64xf32>
    %cst_115 = arith.constant dense<0.000000e+00> : vector<16x64xf32>
    %299 = tpu.matmul %296, %298, %cst_115 {dimension_numbers = #tpu.dot_dimension_numbers<[1], [0], [0], [1], [0, 0, 1, 1], [], []>} : vector<16x32xf32>, vector<32x64xf32>, vector<16x64xf32> -> vector<16x64xf32>
    %c1_116 = arith.constant 1 : index
    %c0_117 = arith.constant 0 : index
    %c0_118 = arith.constant 0 : index
    %300 = vector.load %arg15[%c1_116, %c0_117, %c0_118] : memref<2x1x64xf32, #tpu.memory_space<vmem>>, vector<1x1x64xf32>
    %301 = vector.shape_cast %300 : vector<1x1x64xf32> to vector<1x64xf32>
    %302 = vector.broadcast %301 : vector<1x64xf32> to vector<16x64xf32>
    %303 = arith.addf %299, %302 : vector<16x64xf32>
    %cst_119 = arith.constant 5.000000e-01 : f32
    %304 = vector.broadcast %cst_119 : f32 to vector<16x64xf32>
    %305 = arith.mulf %304, %303 : vector<16x64xf32>
    %cst_120 = arith.constant 4.471500e-02 : f32
    %306 = vector.broadcast %cst_120 : f32 to vector<16x64xf32>
    %307 = arith.mulf %306, %303 : vector<16x64xf32>
    %308 = arith.mulf %307, %303 : vector<16x64xf32>
    %309 = arith.mulf %308, %303 : vector<16x64xf32>
    %310 = arith.addf %303, %309 : vector<16x64xf32>
    %cst_121 = arith.constant 0.797884583 : f32
    %311 = vector.broadcast %cst_121 : f32 to vector<16x64xf32>
    %312 = arith.mulf %311, %310 : vector<16x64xf32>
    %313 = math.tanh %312 : vector<16x64xf32>
    %cst_122 = arith.constant 1.000000e+00 : f32
    %314 = vector.broadcast %cst_122 : f32 to vector<16x64xf32>
    %315 = arith.addf %314, %313 : vector<16x64xf32>
    %316 = arith.mulf %305, %315 : vector<16x64xf32>
    %c1_123 = arith.constant 1 : index
    %c0_124 = arith.constant 0 : index
    %c0_125 = arith.constant 0 : index
    %317 = vector.load %arg16[%c1_123, %c0_124, %c0_125] : memref<2x64x32xf32, #tpu.memory_space<vmem>>, vector<1x64x32xf32>
    %318 = vector.shape_cast %317 : vector<1x64x32xf32> to vector<64x32xf32>
    %cst_126 = arith.constant dense<0.000000e+00> : vector<16x32xf32>
    %319 = tpu.matmul %316, %318, %cst_126 {dimension_numbers = #tpu.dot_dimension_numbers<[1], [0], [0], [1], [0, 0, 1, 1], [], []>} : vector<16x64xf32>, vector<64x32xf32>, vector<16x32xf32> -> vector<16x32xf32>
    %c1_127 = arith.constant 1 : index
    %c0_128 = arith.constant 0 : index
    %c0_129 = arith.constant 0 : index
    %320 = vector.load %arg17[%c1_127, %c0_128, %c0_129] : memref<2x1x32xf32, #tpu.memory_space<vmem>>, vector<1x1x32xf32>
    %321 = vector.shape_cast %320 : vector<1x1x32xf32> to vector<1x32xf32>
    %322 = vector.broadcast %321 : vector<1x32xf32> to vector<16x32xf32>
    %323 = arith.addf %319, %322 : vector<16x32xf32>
    %324 = arith.addf %323, %296 : vector<16x32xf32>
    %c1_130 = arith.constant 1 : index
    %c0_131 = arith.constant 0 : index
    %c0_132 = arith.constant 0 : index
    %325 = vector.load %arg18[%c1_130, %c0_131, %c0_132] : memref<2x1x32xf32, #tpu.memory_space<vmem>>, vector<1x1x32xf32>
    %326 = vector.shape_cast %325 : vector<1x1x32xf32> to vector<1x32xf32>
    %c1_133 = arith.constant 1 : index
    %c0_134 = arith.constant 0 : index
    %c0_135 = arith.constant 0 : index
    %327 = vector.load %arg19[%c1_133, %c0_134, %c0_135] : memref<2x1x32xf32, #tpu.memory_space<vmem>>, vector<1x1x32xf32>
    %328 = vector.shape_cast %327 : vector<1x1x32xf32> to vector<1x32xf32>
    %cst_136 = arith.constant dense<0.000000e+00> : vector<16xf32>
    %329 = vector.multi_reduction <add>, %324, %cst_136 [1] : vector<16x32xf32> to vector<16xf32>
    %330 = vector.shape_cast %329 : vector<16xf32> to vector<16x1xf32>
    %cst_137 = arith.constant 3.200000e+01 : f32
    %331 = vector.broadcast %cst_137 : f32 to vector<16x1xf32>
    %332 = arith.divf %330, %331 : vector<16x1xf32>
    %333 = arith.mulf %324, %324 : vector<16x32xf32>
    %cst_138 = arith.constant dense<0.000000e+00> : vector<16xf32>
    %334 = vector.multi_reduction <add>, %333, %cst_138 [1] : vector<16x32xf32> to vector<16xf32>
    %335 = vector.shape_cast %334 : vector<16xf32> to vector<16x1xf32>
    %cst_139 = arith.constant 3.200000e+01 : f32
    %336 = vector.broadcast %cst_139 : f32 to vector<16x1xf32>
    %337 = arith.divf %335, %336 : vector<16x1xf32>
    %338 = arith.mulf %332, %332 : vector<16x1xf32>
    %339 = arith.subf %337, %338 : vector<16x1xf32>
    %340 = vector.broadcast %332 : vector<16x1xf32> to vector<16x32xf32>
    %341 = arith.subf %324, %340 : vector<16x32xf32>
    %cst_140 = arith.constant 9.99999996E-13 : f32
    %342 = vector.broadcast %cst_140 : f32 to vector<16x1xf32>
    %343 = arith.addf %339, %342 : vector<16x1xf32>
    %344 = math.rsqrt %343 : vector<16x1xf32>
    %345 = vector.broadcast %344 : vector<16x1xf32> to vector<16x32xf32>
    %346 = arith.mulf %341, %345 : vector<16x32xf32>
    %347 = vector.broadcast %326 : vector<1x32xf32> to vector<16x32xf32>
    %348 = arith.mulf %346, %347 : vector<16x32xf32>
    %349 = vector.broadcast %328 : vector<1x32xf32> to vector<16x32xf32>
    %350 = arith.addf %348, %349 : vector<16x32xf32>
    %c0_141 = arith.constant 0 : index
    %c0_142 = arith.constant 0 : index
    %351 = vector.load %arg20[%c0_141, %c0_142] : memref<16x32xf32, #tpu.memory_space<vmem>>, vector<16x32xf32>
    tpu.vector_store %arg20[%c0_141, %c0_142], %350 {strides = array<i32>} : memref<16x32xf32, #tpu.memory_space<vmem>>, vector<16x32xf32>,
    return
  }
}

</mosaic_0001>

<bundles_post_ra>
// kernel: report_encoder_forward.1
= control target key start
LH: loop header
LB: loop body
LE: loop exit
PB: predicated region body
PF: predicated region fallthrough
CT: control target
= control target key end

     0   :  { %s5651_s0 = inlined_call_operand.vmem [shape: s32[16,1], index: 0, kind: input, shape index: {}]   ;;  %s5652_s1 = inlined_call_operand.vmem [shape: s32[16,1], index: 1, kind: input, shape index: {}]   ;;  %s5653_s2 = inlined_call_operand.vmem [shape: s32[2,1,8], index: 2, kind: input, shape index: {}]   ;;  %s5654_s3 = inlined_call_operand.vmem [shape: f32[50,32], index: 3, kind: input, shape index: {}]   ;;  %s5655_s4 = inlined_call_operand.vmem [shape: f32[16,32], index: 4, kind: input, shape index: {}]   ;;  %s5656_s5 = inlined_call_operand.vmem [shape: f32[2,32], index: 5, kind: input, shape index: {}]   ;;  %s5657_s6 = inlined_call_operand.vmem [shape: f32[1,32], index: 6, kind: input, shape index: {}]   ;;  %s5658_s7 = inlined_call_operand.vmem [shape: f32[1,32], index: 7, kind: input, shape index: {}]   ;;  %s5659_s8 = inlined_call_operand.vmem [shape: f32[2,32,96], index: 8, kind: input, shape index: {}]   ;;  %s5660_s9 = inlined_call_operand.vmem [shape: f32[2,1,96], index: 9, kind: input, shape index: {}]   ;;  %s5661_s10 = inlined_call_operand.vmem [shape: f32[2,32,32], index: 10, kind: input, shape index: {}]   ;;  %s5662_s11 = inlined_call_operand.vmem [shape: f32[2,1,32], index: 11, kind: input, shape index: {}]   ;;  %s5663_s12 = inlined_call_operand.vmem [shape: f32[2,1,32], index: 12, kind: input, shape index: {}]   ;;  %s5664_s13 = inlined_call_operand.vmem [shape: f32[2,1,32], index: 13, kind: input, shape index: {}]   ;;  %s5665_s14 = inlined_call_operand.vmem [shape: f32[2,32,64], index: 14, kind: input, shape index: {}]   ;;  %s5666_s15 = inlined_call_operand.vmem [shape: f32[2,1,64], index: 15, kind: input, shape index: {}]   ;;  %s5667_s16 = inlined_call_operand.vmem [shape: f32[2,64,32], index: 16, kind: input, shape index: {}]   ;;  %s5668_s17 = inlined_call_operand.vmem [shape: f32[2,1,32], index: 17, kind: input, shape index: {}]   ;;  %s5669_s18 = inlined_call_operand.vmem [shape: f32[2,1,32], index: 18, kind: input, shape index: {}]   ;;  %s5670_s19 = inlined_call_operand.vmem [shape: f32[2,1,32], index: 19, kind: input, shape index: {}]   ;;  %s5671_s20 = inlined_call_operand.hbm [shape: f32[16,32], index: 20, kind: output, shape index: {}]  }
   0x1   :  { %5677 = sst [smem:[#allocation5_spill]] %s5651_s0 }
   0x2   :  { %5678 = sst [smem:[#allocation6_spill]] %s5652_s1 }
   0x3   :  { %5679 = sst [smem:[#allocation7_spill]] %s5653_s2 }
   0x4   :  { %5680 = sst [smem:[#allocation8_spill]] %s5654_s3 }
   0x5   :  { %5681 = sst [smem:[#allocation9_spill]] %s5655_s4 }
   0x6   :  { %5682 = sst [smem:[#allocation10_spill]] %s5666_s15 }
   0x7   :  { %s5683_s23 = sld [smem:[#allocation6_spill]]  ;;  %s5684_s15 = sld [smem:[#allocation5_spill]]  ;;  %v4853_v2 = vmov 0  }
   0x8   :  { %4735 = vset.pattern.permute.xlu0 %v4853_v2  ;;  %4736 = vset.pattern.permute.xlu1 %v4853_v2 }
   0xd   :  { %v89_v0 = vld [vmem:[%s5683_s23] sm:$0xff] }
   0xe   :  { %v66_v1 = vld [vmem:[%s5684_s15] sm:$0xff] }
   0xf   :  { %25 = vsyncpa [#allocation3], 0  ;;  %92 = vperm.xlu0 %4735, %v89_v0   ;;  %71 = vperm.xlu1 %4736, %v66_v1   ;;  %v90_v3 = vld [vmem:[%s5683_s23 + $0x8] sm:$0xff]  ;;  %vm111_vm0 = vcmask 1041408   ;;  %v103_v5 = vld [vmem:[%s5656_s5] sm:$0x3]  ;;  %v68_v9 = vlaneseq }
  0x10   :  { %v67_v4 = vld [vmem:[%s5684_s15 + $0x8] sm:$0xff]  ;;  %s5685_s0 = sld [smem:[#allocation8_spill]]  ;;  %4342 = vmatprep.subr.msk.mxu0 %vm111_vm0, %v103_v5  ;;  %vm104_vm1 = vcmask 15360   ;;  %v4854_v13 = vmov 0.0   ;;  %vm190_vm5 = vcmask 408576   ;;  %s5686_s29 = sld [smem:[#allocation9_spill]] }
  0x11   :  { %4343 = vmatpush3.msk.msra.mxu0 %vm111_vm0, %v103_v5  ;;  %v69_v10 = vand.u32 127, %v68_v9  ;;  %vm280_vm7 = vcmask 261120   ;;  %v336_v38 = vld [vmem:[%s5659_s8] sm:$0xff]  ;;  %v337_v39 = vld [vmem:[%s5659_s8 + $0x8] sm:$0xff]  ;;  %v338_v40 = vld [vmem:[%s5659_s8 + $0x10] sm:$0xff]  ;;  %vm4855_vm8 = vmmov 0  }
  0x12   :  { %v4640_v41 = vpack.c.bf16 %v337_v39, %v336_v38  ;;  %v339_v42 = vld [vmem:[%s5659_s8 + $0x18] sm:$0xff]  ;;  %v4100_v60 = vld [vmem:[%s5657_s6] ss:$0 sm:$0xff]  ;;  %s4857_s27 = smov 104   ;;  %s4858_s28 = smov 112   ;;  %vm444_vm9 = vcmask 64512  }
  0x13   :  { %95 = vperm.xlu0 %4735, %v90_v3   ;;  %74 = vperm.xlu1 %4736, %v67_v4   ;;  %v4644_v43 = vpack.c.bf16 %v339_v42, %v338_v40  ;;  %v4101_v62 = vld [vmem:[%s5658_s7] ss:$0 sm:$0xff]  ;;  %s4856_s7 = smov 120   ;;  %s4859_s4 = smov 96   ;;  %vm1801_vm10 = vcmask 130048   ;;  %vm1804_vm11 = vcmask 195584  }
  0x14   :  { %4641 = vmatprep.subr.bf16.mxu1 %v4640_v41  ;;  %s4860_s5 = smov 64   ;;  %s4861_s26 = smov 8   ;;  %vm2074_vm12 = vcmask 523264  }
  0x15   :  { %4643 = vmatpush3.bf16.msra.mxu1 %v4640_v41  ;;  %s4863_s30 = smov 24   ;;  %s5688_s6 = sld [smem:[#allocation10_spill]] }
  0x16   :  { %v82_v6 = vld [vmem:[%s5685_s0] sm:$0xff]  ;;  %v83_v7 = vld [vmem:[%s5685_s0 + $0x8] sm:$0xff]  ;;  %v84_v15 = vld [vmem:[%s5685_s0 + $0x10] sm:$0xff]  ;;  %4645 = vmatprep.subr.bf16.mxu1 %v4644_v43  ;;  %s4864_s1 = smov [#allocation2]  }
  0x17   :  { %v4628_v8 = vpack.c.bf16 %v83_v7, %v82_v6  ;;  %v85_v16 = vld [vmem:[%s5685_s0 + $0x18] sm:$0xff]  ;;  %v86_v21 = vld [vmem:[%s5685_s0 + $0x20] sm:$0xff]  ;;  %v87_v22 = vld [vmem:[%s5685_s0 + $0x28] sm:$0xff]  ;;  %s4079_s15 = sshll.u32 %s4864_s1, 4  ;;  %s4080_s15 = int_to_ptr.vmem [resolvable:$true] %s4079_s15 }
  0x18   :  { %v4632_v19 = vpack.c.bf16 %v85_v16, %v84_v15  ;;  %v4636_v23 = vpack.c.bf16 %v87_v22, %v86_v21  ;;  %v88_v25 = vld [vmem:[%s5685_s0 + $0x30] sm:$0x3]  ;;  %v275_v27 = vld [vmem:[%s5686_s29] sm:$0xff]  ;;  %s5687_s0 = sld [smem:[#allocation7_spill]]  ;;  %s4862_s29 = smov 16  }
  0x19   :  { %4629 = vmatprep.subr.bf16.mxu0 %v4628_v8  ;;  %4647 = vmatpush3.bf16.msra.mxu1 %v4644_v43  ;;  %v4102_v6 = vld [vmem:[%s5660_s9] ss:$0 sm:$0xff]  ;;  %s4829_s22 = scalar_lea.vmem %s4080_s15, 256  ;;  %p4834_p1 = scmp.lt.s32.totalorder %s4080_s15, %s4080_s15 }
  0x1a   :  { %4375 = vmatprep.subr.mxu1 %v4854_v13  ;;  %p4830_p0 = scmp.ne.s32.totalorder %s4080_s15, %s4829_s22  ;;  %p4835_p2 = scmp.lt.s32.totalorder %s4829_s22, %s4829_s22 }
  0x1c   :  { %p4836_p3 = por %p4835_p2, %p4834_p1 }
  0x1e   :  { %p4837_p4 = pnand %p4836_p3, %p4830_p0 }
  0x8e   :  { %v93_v11 = vpop.permute.xlu0 %92  ;;  %v72_v12 = vpop.permute.xlu1 %71 }
  0x8f   :  { %vm97_vm2 = vcmp.eq.s32.totalorder %v69_v10, %v93_v11  ;;  %vm76_vm3 = vcmp.eq.s32.totalorder %v69_v10, %v72_v12 }
  0x90   :  { %v4092_v14 = vsel %vm97_vm2, 1.0, %v4854_v13  ;;  %v4090_v18 = vsel %vm76_vm3, 1.0, %v4854_v13 }
  0x91   :  { %4344 = vmatprep.mubr.msk.f32.mxu0 %vm104_vm1, %v4092_v14 }
  0x92   :  { %v96_v17 = vpop.permute.xlu0 %95  ;;  %v75_v24 = vpop.permute.xlu1 %74 }
  0x93   :  { %vm98_vm4 = vcmp.eq.s32.totalorder %v69_v10, %v96_v17  ;;  %vm77_vm6 = vcmp.eq.s32.totalorder %v69_v10, %v75_v24 }
  0x94   :  { %v4093_v20 = vsel %vm98_vm4, 1.0, %v4854_v13  ;;  %v4091_v26 = vsel %vm77_vm6, 1.0, %v4854_v13 }
  0x95   :  { %4345 = vmatmul.mubr.msk.f32.vlgmr.msra.gmra.mrb[0].mxu0 %vm104_vm1, %v4093_v20 }
  0x96   :  { %4631 = vmatpush3.bf16.msra.mxu0 %v4628_v8  ;;  %4361 = vmatprep.mubr.msk.f32.mxu0 %vm190_vm5, %v4090_v18 }
  0x97   :  { %4633 = vmatprep.subr.bf16.mxu0 %v4632_v19 }
  0x9a   :  { %4635 = vmatpush3.bf16.msra.mxu0 %v4632_v19 }
  0x9b   :  { %4637 = vmatprep.subr.bf16.mxu0 %v4636_v23 }
  0x9e   :  { %4639 = vmatpush3.bf16.msra.mxu0 %v4636_v23 }
  0x9f   :  { %4359 = vmatprep.subr.msk.mxu0 %vm111_vm0, %v88_v25 }
  0xa2   :  { %4360 = vmatpush3.msk.msra.mxu0 %vm111_vm0, %v88_v25 }
  0xa3   :  { %4362 = vmatmul.mubr.msk.f32.vlgmr.msra.gmra.mrb[0].mxu0 %vm190_vm5, %v4091_v26  ;;  %4385 = vmatprep.subr.mxu0 %v4854_v13 }
  0xa4   :  { %4387 = vmatprep.mubr.msk.f32.mxu0 %vm4855_vm8, %v4854_v13 }
 0x176   :  { %v4363_v28 = vpop.f32.mrb[0].mxu0 }
 0x177   :  { %v277_v29 = vadd.f32 %v4363_v28, %v275_v27  ;;  %v266_v30 = vpop.f32.mrb[1].mxu0 }
 0x178   :  { %v276_v31 = vadd.f32 %v275_v27, %v266_v30  ;;  %v328_v27 = vld [vmem:[%s5687_s0] sm:$0x1]  ;;  %v1062_v30 = vshrl.u32 %v68_v9, 7 }
 0x179   :  { %v284_v32 = vsel %vm280_vm7, %v277_v29, 0.0  ;;  %v291_v36 = vmul.f32 %v277_v29, %v277_v29  ;;  %v330_v28 = vcvt.s32.f32 %v328_v27 }
 0x17a   :  { %285 = vadd.xlane.f32.xlu1 %v284_v32  ;;  %v281_v33 = vsel %vm280_vm7, %v276_v31, 0.0  ;;  %v290_v34 = vmul.f32 %v276_v31, %v276_v31 }
 0x17b   :  { %282 = vadd.xlane.f32.xlu0 %v281_v33  ;;  %v295_v37 = vsel %vm280_vm7, %v291_v36, 0.0  ;;  %v1063_v33 = vsub.s32 0, %v1062_v30 }
 0x17c   :  { %v292_v35 = vsel %vm280_vm7, %v290_v34, 0.0 }
 0x17f   :  { %293 = vadd.xlane.f32.xlu0 %v292_v35 }
 0x183   :  { %296 = vadd.xlane.f32.xlu0 %v295_v37 }
 0x207   :  { %v286_v46 = vpop.xlane.xlu1 %285 }
 0x208   :  { %v283_v44 = vpop.xlane.xlu0 %282  ;;  %v289_v48 = vmul.f32 0.03125, %v286_v46 }
 0x209   :  { %v288_v45 = vmul.f32 0.03125, %v283_v44 }
 0x20a   :  { %v301_v53 = vmul.f32 %v289_v48, %v289_v48  ;;  %v305_v63 = vsub.f32 %v277_v29, %v289_v48  ;;  %v332_v29 = vsub.f32 1.0, %v330_v28 }
 0x20b   :  { %v300_v49 = vmul.f32 %v288_v45, %v288_v45  ;;  %v304_v58 = vsub.f32 %v276_v31, %v288_v45  ;;  %v329_v31 = vld [vmem:[%s5687_s0 + $0x1] sm:$0x1] }
 0x20c   :  { %v294_v47 = vpop.xlane.xlu0 %293  ;;  %v334_v32 = vmul.f32 -10000.0, %v332_v29  ;;  %v331_v34 = vcvt.s32.f32 %v329_v31 }
 0x20d   :  { %v298_v50 = vmul.f32 0.03125, %v294_v47 }
 0x20e   :  { %v5161_v35 = vrot.slane %v334_v32, %v1063_v33  ;;  %v333_v36 = vsub.f32 1.0, %v331_v34 }
 0x20f   :  { %v302_v51 = vsub.f32 %v298_v50, %v300_v49 }
 0x210   :  { %v297_v52 = vpop.xlane.xlu0 %296  ;;  %v335_v41 = vmul.f32 -10000.0, %v333_v36 }
 0x211   :  { %v306_v54 = vadd.f32 1e-12, %v302_v51  ;;  %v299_v55 = vmul.f32 0.03125, %v297_v52 }
 0x212   :  { %v5165_v9 = vrot.slane %v335_v41, %v1063_v33 }
 0x213   :  { %4737 = vrsqrt.f32 %v306_v54  ;;  %v303_v56 = vsub.f32 %v299_v55, %v301_v53 }
 0x215   :  { %v307_v57 = vadd.f32 1e-12, %v303_v56 }
 0x217   :  { %4739 = vrsqrt.f32 %v307_v57 }
 0x21d   :  { %v4738_v59 = vpop.eup %4737 }
 0x21e   :  { %v310_v61 = vmul.f32 %v4738_v59, %v304_v58 }
 0x220   :  { %v318_v0 = vmul.f32 %v4100_v60, %v310_v61 }
 0x221   :  { %v4740_v1 = vpop.eup %4739 }
 0x222   :  { %v311_v2 = vmul.f32 %v4740_v1, %v305_v63  ;;  %v5047_v3 = vadd.f32 %v4101_v62, %v318_v0 }
 0x224   :  { %v319_v4 = vmul.f32 %v4100_v60, %v311_v2  ;;  %4372 = vmatprep.mubr.msk.f32.mxu1 %vm280_vm7, %v5047_v3 }
 0x226   :  { %v5051_v5 = vadd.f32 %v4101_v62, %v319_v4 }
 0x228   :  { %4373 = vmatmul.mubr.msk.f32.vlgmr.msra.gmra.mrb[0].mxu1 %vm280_vm7, %v5051_v5 }
 0x229   :  { %4377 = vmatprep.mubr.msk.f32.mxu1 %vm4855_vm8, %v4854_v13 }
 0x2fb   :  { %v4374_v7 = vpop.f32.mrb[0].mxu1 }
 0x2fc   :  { %v5062_v8 = vadd.f32 %v4374_v7, %v4102_v6  ;;  %v419_v10 = vpop.f32.mrb[1].mxu1 }
 0x2fd   :  { %v5064_v11 = vadd.f32 %v4102_v6, %v419_v10 }
 0x2fe   :  { %432 = vrot.lane.b32.xlu0 %v5062_v8, %s4856_s7 }
 0x2ff   :  { %430 = vrot.lane.b32.xlu1 %v5064_v11, %s4856_s7 }
 0x302   :  { %438 = vrot.lane.b32.xlu0 %v5064_v11, %s4857_s27 }
 0x303   :  { %434 = vrot.lane.b32.xlu1 %v5064_v11, %s4858_s28 }
 0x306   :  { %442 = vrot.lane.b32.xlu0 %v5064_v11, %s4859_s4 }
 0x307   :  { %436 = vrot.lane.b32.xlu1 %v5062_v8, %s4858_s28 }
 0x30b   :  { %440 = vrot.lane.b32.xlu1 %v5062_v8, %s4857_s27 }
 0x30f   :  { %519 = vrot.lane.b32.xlu1 %v5062_v8, %s4859_s4 }
 0x370   :  { %v5082_v12 = vpop.permute.xlu0 %432 }
 0x371   :  { %671 = vrot.lane.b32.xlu1 %v5082_v12, %s4859_s4  ;;  %v5086_v14 = vpop.permute.xlu1 %430 }
 0x372   :  { %595 = vrot.lane.b32.xlu0 %v5086_v14, %s4859_s4 }
 0x374   :  { %v5090_v15 = vpop.permute.xlu0 %438 }
 0x375   :  { %v5092_v16 = vpop.permute.xlu1 %434 }
 0x376   :  { %747 = vrot.lane.b32.xlu0 %v5092_v16, %s4859_s4 }
 0x378   :  { %v443_v17 = vpop.permute.xlu0 %442 }
 0x379   :  { %4376 = vmatpush3.xpose.msk.msra.mxu1 %vm444_vm9, %v443_v17  ;;  %v5097_v18 = vpop.permute.xlu1 %436 }
 0x37a   :  { %899 = vrot.lane.b32.xlu0 %v5090_v15, %s4859_s4  ;;  %823 = vrot.lane.b32.xlu1 %v5097_v18, %s4859_s4 }
 0x37b   :  { %4380 = vmatprep.subr.mxu1 %v4854_v13 }
 0x37c   :  { %4378 = vmatmul.mubr.msk.f32.vlgmr.msra.gmra.mrb[2].mxu1 %vm444_vm9, %v5064_v11 }
 0x37d   :  { %v5106_v19 = vpop.permute.xlu1 %440  ;;  %4382 = vmatprep.mubr.msk.f32.mxu1 %vm4855_vm8, %v4854_v13 }
 0x37e   :  { %975 = vrot.lane.b32.xlu1 %v5106_v19, %s4859_s4 }
 0x381   :  { %v520_v20 = vpop.permute.xlu1 %519 }
 0x382   :  { %4381 = vmatpush3.xpose.msk.msra.mxu1 %vm444_vm9, %v520_v20 }
 0x383   :  { %4390 = vmatprep.subr.mxu1 %v4854_v13 }
 0x385   :  { %4383 = vmatmul.mubr.msk.f32.vlgmr.msra.gmra.mrb[4].mxu1 %vm444_vm9, %v5062_v8 }
 0x386   :  { %4392 = vmatprep.mubr.msk.f32.mxu1 %vm4855_vm8, %v4854_v13 }
 0x3e3   :  { %v672_v21 = vpop.permute.xlu1 %671 }
 0x3e4   :  { %v596_v22 = vpop.permute.xlu0 %595  ;;  %4391 = vmatpush3.xpose.msk.msra.mxu1 %vm444_vm9, %v672_v21 }
 0x3e5   :  { %4386 = vmatpush3.xpose.msk.msra.mxu0 %vm444_vm9, %v596_v22  ;;  %4400 = vmatprep.subr.mxu1 %v4854_v13 }
 0x3e6   :  { %4395 = vmatprep.subr.mxu0 %v4854_v13 }
 0x3e7   :  { %4393 = vmatmul.mubr.msk.f32.vlgmr.msra.gmra.mrb[6].mxu1 %vm444_vm9, %v5082_v12 }
 0x3e8   :  { %4388 = vmatmul.mubr.msk.f32.vlgmr.msra.gmra.mrb[2].mxu0 %vm444_vm9, %v5086_v14  ;;  %v748_v23 = vpop.permute.xlu0 %747  ;;  %4402 = vmatprep.mubr.msk.f32.mxu1 %vm4855_vm8, %v4854_v13 }
 0x3e9   :  { %4396 = vmatpush3.xpose.msk.msra.mxu0 %vm444_vm9, %v748_v23  ;;  %4397 = vmatprep.mubr.msk.f32.mxu0 %vm4855_vm8, %v4854_v13 }
 0x3ea   :  { %4405 = vmatprep.subr.mxu0 %v4854_v13 }
 0x3ec   :  { %4398 = vmatmul.mubr.msk.f32.vlgmr.msra.gmra.mrb[4].mxu0 %vm444_vm9, %v5092_v16  ;;  %v900_v24 = vpop.permute.xlu0 %899  ;;  %v824_v25 = vpop.permute.xlu1 %823 }
 0x3ed   :  { %4401 = vmatpush3.xpose.msk.msra.mxu1 %vm444_vm9, %v824_v25  ;;  %4406 = vmatpush3.xpose.msk.msra.mxu0 %vm444_vm9, %v900_v24 }
 0x3ee   :  { %4407 = vmatprep.mubr.msk.f32.mxu0 %vm4855_vm8, %v4854_v13  ;;  %4410 = vmatprep.subr.mxu1 %v4854_v13 }
 0x3ef   :  { %4415 = vmatprep.subr.mxu0 %v4854_v13 }
 0x3f0   :  { %4403 = vmatmul.mubr.msk.f32.vlgmr.msra.gmra.mrb[8].mxu1 %vm444_vm9, %v5097_v18  ;;  %4408 = vmatmul.mubr.msk.f32.vlgmr.msra.gmra.mrb[6].mxu0 %vm444_vm9, %v5090_v15  ;;  %v976_v26 = vpop.permute.xlu1 %975 }
 0x3f1   :  { %4411 = vmatpush3.xpose.msk.msra.mxu1 %vm444_vm9, %v976_v26  ;;  %4412 = vmatprep.mubr.msk.f32.mxu1 %vm4855_vm8, %v4854_v13 }
 0x3f2   :  { %4420 = vmatprep.subr.mxu1 %v4854_v13  ;;  %4417 = vmatprep.mubr.msk.f32.mxu0 %vm4855_vm8, %v4854_v13 }
 0x3f4   :  { %4413 = vmatmul.mubr.msk.f32.vlgmr.msra.gmra.mrb[10].mxu1 %vm444_vm9, %v5106_v19 }
 0x3f5   :  { %4422 = vmatprep.mubr.msk.f32.mxu1 %vm4855_vm8, %v4854_v13 }
 0x44f   :  { %v515_v37 = vpop.f32.mrb[2].mxu1 }
 0x450   :  { %v1051_v38 = vmul.f32 0.35355338, %v515_v37  ;;  %v4379_v39 = vpop.f32.mrb[3].mxu1 }
 0x452   :  { %v1071_v40 = vadd.f32 %v5161_v35, %v1051_v38 }
 0x454   :  { %v1079_v42 = vsel %vm444_vm9, %v1071_v40, -inf }
 0x455   :  { %1080 = vmax.xlane.f32.xlu0 %v1079_v42 }
 0x458   :  { %v591_v43 = vpop.f32.mrb[4].mxu1 }
 0x459   :  { %v1052_v44 = vmul.f32 0.35355338, %v591_v43  ;;  %v4384_v45 = vpop.f32.mrb[5].mxu1 }
 0x45b   :  { %v1072_v46 = vadd.f32 %v5165_v9, %v1052_v44 }
 0x45d   :  { %v1082_v47 = vsel %vm444_vm9, %v1072_v46, -inf }
 0x45e   :  { %1083 = vmax.xlane.f32.xlu1 %v1082_v47 }
 0x4ba   :  { %v743_v48 = vpop.f32.mrb[6].mxu1 }
 0x4bb   :  { %v1054_v49 = vmul.f32 0.35355338, %v743_v48  ;;  %v667_v50 = vpop.f32.mrb[2].mxu0  ;;  %v4394_v51 = vpop.f32.mrb[7].mxu1 }
 0x4bc   :  { %v1053_v52 = vmul.f32 0.35355338, %v667_v50  ;;  %v4389_v53 = vpop.f32.mrb[3].mxu0 }
 0x4bd   :  { %v1074_v56 = vadd.f32 %v5165_v9, %v1054_v49 }
 0x4be   :  { %v1073_v54 = vadd.f32 %v5161_v35, %v1053_v52 }
 0x4bf   :  { %v819_v55 = vpop.f32.mrb[4].mxu0  ;;  %v1088_v63 = vsel %vm444_vm9, %v1074_v56, -inf }
 0x4c0   :  { %v1055_v57 = vmul.f32 0.35355338, %v819_v55  ;;  %v4399_v58 = vpop.f32.mrb[5].mxu0  ;;  %v1085_v59 = vsel %vm444_vm9, %v1073_v54, -inf }
 0x4c1   :  { %1086 = vmax.xlane.f32.xlu0 %v1085_v59 }
 0x4c2   :  { %v1075_v60 = vadd.f32 %v5161_v35, %v1055_v57 }
 0x4c3   :  { %v895_v61 = vpop.f32.mrb[8].mxu1  ;;  %v971_v62 = vpop.f32.mrb[6].mxu0 }
 0x4c4   :  { %v1056_v0 = vmul.f32 0.35355338, %v895_v61  ;;  %v1057_v1 = vmul.f32 0.35355338, %v971_v62  ;;  %v4404_v2 = vpop.f32.mrb[9].mxu1  ;;  %v4409_v4 = vpop.f32.mrb[7].mxu0 }
 0x4c5   :  { %v1091_v6 = vsel %vm444_vm9, %v1075_v60, -inf  ;;  %1089 = vmax.xlane.f32.xlu0 %v1088_v63 }
 0x4c6   :  { %1092 = vmax.xlane.f32.xlu1 %v1091_v6  ;;  %v1077_v7 = vadd.f32 %v5161_v35, %v1057_v1  ;;  %v1076_v10 = vadd.f32 %v5165_v9, %v1056_v0 }
 0x4c7   :  { %v1047_v17 = vpop.f32.mrb[10].mxu1 }
 0x4c8   :  { %v1058_v20 = vmul.f32 0.35355338, %v1047_v17  ;;  %v4414_v21 = vpop.f32.mrb[11].mxu1  ;;  %v1097_v22 = vsel %vm444_vm9, %v1077_v7, -inf  ;;  %v1094_v23 = vsel %vm444_vm9, %v1076_v10, -inf }
 0x4c9   :  { %1095 = vmax.xlane.f32.xlu0 %v1094_v23 }
 0x4ca   :  { %1098 = vmax.xlane.f32.xlu1 %v1097_v22  ;;  %v1078_v24 = vadd.f32 %v5165_v9, %v1058_v20 }
 0x4cc   :  { %v1100_v25 = vsel %vm444_vm9, %v1078_v24, -inf }
 0x4cd   :  { %1101 = vmax.xlane.f32.xlu0 %v1100_v25 }
 0x4db   :  { %1167 = vrot.lane.b32.xlu1 %v5064_v11, %s4860_s5 }
 0x4df   :  { %1319 = vrot.lane.b32.xlu1 %v5086_v14, %s4860_s5 }
 0x4e2   :  { %v1081_v28 = vpop.xlane.xlu0 %1080 }
 0x4e3   :  { %1395 = vrot.lane.b32.xlu1 %v5082_v12, %s4860_s5  ;;  %1243 = vrot.lane.b32.xlu0 %v5062_v8, %s4860_s5  ;;  %v1103_v11 = vsub.f32 %v1071_v40, %v1081_v28 }
 0x4e5   :  { %v1111_v30 = vmul.f32 1.442695, %v1103_v11 }
 0x4e7   :  { %1547 = vrot.lane.b32.xlu1 %v5097_v18, %s4860_s5  ;;  %1471 = vrot.lane.b32.xlu0 %v5092_v16, %s4860_s5 }
 0x4eb   :  { %v1084_v26 = vpop.xlane.xlu1 %1083 }
 0x4ec   :  { %v1104_v27 = vsub.f32 %v1072_v46, %v1084_v26 }
 0x4ee   :  { %v1113_v29 = vmul.f32 1.442695, %v1104_v27 }
 0x4f0   :  { %4741 = vpow2.f32 %v1113_v29 }
 0x4f1   :  { %4743 = vpow2.f32 %v1111_v30 }
 0x4fa   :  { %v5193_v14 = vpop.eup %4741 }
 0x4fb   :  { %v1130_v12 = vsel %vm444_vm9, %v5193_v14, 0.0  ;;  %v5197_v8 = vpop.eup %4743 }
 0x4fc   :  { %v1127_v18 = vsel %vm444_vm9, %v5197_v8, 0.0 }
 0x506   :  { %1131 = vadd.xlane.f32.xlu0 %v1130_v12 }
 0x50b   :  { %1128 = vadd.xlane.f32.xlu1 %v1127_v18 }
 0x54e   :  { %v1087_v16 = vpop.xlane.xlu0 %1086 }
 0x54f   :  { %v1105_v31 = vsub.f32 %v1073_v54, %v1087_v16 }
 0x551   :  { %v1115_v32 = vmul.f32 1.442695, %v1105_v31 }
 0x552   :  { %v1090_v33 = vpop.xlane.xlu0 %1089 }
 0x553   :  { %4745 = vpow2.f32 %v1115_v32  ;;  %v1106_v34 = vsub.f32 %v1074_v56, %v1090_v33  ;;  %v1093_v36 = vpop.xlane.xlu1 %1092 }
 0x554   :  { %v1107_v37 = vsub.f32 %v1075_v60, %v1093_v36 }
 0x555   :  { %v1117_v38 = vmul.f32 1.442695, %v1106_v34 }
 0x556   :  { %v1119_v39 = vmul.f32 1.442695, %v1107_v37  ;;  %v1096_v40 = vpop.xlane.xlu0 %1095 }
 0x557   :  { %4747 = vpow2.f32 %v1117_v38  ;;  %v1108_v41 = vsub.f32 %v1076_v10, %v1096_v40  ;;  %v1099_v42 = vpop.xlane.xlu1 %1098  ;;  %v1807_v38 = vld [vmem:[%s5661_s10] sm:$0xff] }
 0x558   :  { %4749 = vpow2.f32 %v1119_v39  ;;  %v1109_v43 = vsub.f32 %v1077_v7, %v1099_v42  ;;  %v1808_v39 = vld [vmem:[%s5661_s10 + $0x8] sm:$0xff]  ;;  %v1810_v42 = vld [vmem:[%s5661_s10 + $0x18] sm:$0xff] }
 0x559   :  { %v1121_v44 = vmul.f32 1.442695, %v1108_v41  ;;  %v4648_v40 = vpack.c.bf16 %v1808_v39, %v1807_v38  ;;  %v1809_v41 = vld [vmem:[%s5661_s10 + $0x10] sm:$0xff] }
 0x55a   :  { %v1123_v45 = vmul.f32 1.442695, %v1109_v43  ;;  %v1102_v46 = vpop.xlane.xlu0 %1101  ;;  %v4652_v43 = vpack.c.bf16 %v1810_v42, %v1809_v41  ;;  %v4132_v42 = vld [vmem:[%s5663_s12] ss:$0 sm:$0xff] }
 0x55b   :  { %4751 = vpow2.f32 %v1121_v44  ;;  %v1110_v47 = vsub.f32 %v1078_v24, %v1102_v46  ;;  %v1168_v48 = vpop.permute.xlu1 %1167 }
 0x55c   :  { %4753 = vpow2.f32 %v1123_v45  ;;  %4416 = vmatpush3.msra.mxu0 %v1168_v48 }
 0x55d   :  { %v4746_v49 = vpop.eup %4745  ;;  %v1125_v50 = vmul.f32 1.442695, %v1110_v47  ;;  %4425 = vmatprep.subr.mxu0 %v4854_v13 }
 0x55e   :  { %v1244_v51 = vpop.permute.xlu0 %1243  ;;  %v1133_v52 = vsel %vm444_vm9, %v4746_v49, 0.0 }
 0x55f   :  { %4755 = vpow2.f32 %v1125_v50  ;;  %1134 = vadd.xlane.f32.xlu1 %v1133_v52  ;;  %4421 = vmatpush3.msra.mxu1 %v1244_v51  ;;  %v1320_v63 = vpop.permute.xlu1 %1319 }
 0x560   :  { %4430 = vmatprep.subr.mxu1 %v4854_v13 }
 0x561   :  { %v4748_v53 = vpop.eup %4747 }
 0x562   :  { %v4750_v54 = vpop.eup %4749  ;;  %v1136_v55 = vsel %vm444_vm9, %v4748_v53, 0.0  ;;  %v1472_v1 = vpop.permute.xlu0 %1471 }
 0x563   :  { %1137 = vadd.xlane.f32.xlu0 %v1136_v55  ;;  %v1139_v56 = vsel %vm444_vm9, %v4750_v54, 0.0  ;;  %v1396_v0 = vpop.permute.xlu1 %1395 }
 0x564   :  { %1140 = vadd.xlane.f32.xlu1 %v1139_v56 }
 0x565   :  { %v4752_v57 = vpop.eup %4751 }
 0x566   :  { %v4754_v58 = vpop.eup %4753  ;;  %v1142_v59 = vsel %vm444_vm9, %v4752_v57, 0.0 }
 0x567   :  { %1143 = vadd.xlane.f32.xlu0 %v1142_v59  ;;  %v1145_v60 = vsel %vm444_vm9, %v4754_v58, 0.0  ;;  %v1548_v4 = vpop.permute.xlu1 %1547 }
 0x568   :  { %1146 = vadd.xlane.f32.xlu1 %v1145_v60 }
 0x569   :  { %v5208_v61 = vpop.eup %4755 }
 0x56a   :  { %v1148_v62 = vsel %vm444_vm9, %v5208_v61, 0.0 }
 0x56b   :  { %1149 = vadd.xlane.f32.xlu0 %v1148_v62 }
 0x579   :  { %1699 = vrot.lane.b32.xlu1 %v5106_v19, %s4860_s5 }
 0x581   :  { %1623 = vrot.lane.b32.xlu0 %v5090_v15, %s4860_s5 }
 0x593   :  { %v1132_v2 = vpop.xlane.xlu0 %1131 }
 0x594   :  { %4757 = vrcp.f32 %v1132_v2 }
 0x598   :  { %v1129_v6 = vpop.xlane.xlu1 %1128 }
 0x599   :  { %4759 = vrcp.f32 %v1129_v6  ;;  %v4129_v6 = vld [vmem:[%s5662_s11] ss:$0 sm:$0xff] }
 0x59e   :  { %v4758_v7 = vpop.eup %4757 }
 0x59f   :  { %v1160_v10 = vmul.f32 %v4758_v7, %v5193_v14 }
 0x5a1   :  { %4423 = vmatmul.mubr.msk.f32.vlgmr.msra.gmra.mrb[12].mxu1 %vm444_vm9, %v1160_v10 }
 0x5a2   :  { %4431 = vmatpush3.msra.mxu1 %v1396_v0  ;;  %4432 = vmatprep.mubr.msk.f32.mxu1 %vm4855_vm8, %v4854_v13 }
 0x5a3   :  { %v4760_v19 = vpop.eup %4759  ;;  %4440 = vmatprep.subr.mxu1 %v4854_v13 }
 0x5a4   :  { %v1159_v15 = vmul.f32 %v4760_v19, %v5197_v8 }
 0x5a6   :  { %4418 = vmatmul.mubr.msk.f32.vlgmr.msra.gmra.mrb[8].mxu0 %vm444_vm9, %v1159_v15 }
 0x5a7   :  { %4426 = vmatpush3.msra.mxu0 %v1320_v63  ;;  %4427 = vmatprep.mubr.msk.f32.mxu0 %vm4855_vm8, %v4854_v13 }
 0x5a8   :  { %4435 = vmatprep.subr.mxu0 %v4854_v13 }
 0x5ec   :  { %v1135_v17 = vpop.xlane.xlu1 %1134 }
 0x5ed   :  { %4761 = vrcp.f32 %v1135_v17 }
 0x5f0   :  { %v1138_v20 = vpop.xlane.xlu0 %1137 }
 0x5f1   :  { %4763 = vrcp.f32 %v1138_v20  ;;  %v1141_v21 = vpop.xlane.xlu1 %1140 }
 0x5f2   :  { %4765 = vrcp.f32 %v1141_v21 }
 0x5f4   :  { %v1144_v22 = vpop.xlane.xlu0 %1143 }
 0x5f5   :  { %4767 = vrcp.f32 %v1144_v22  ;;  %v1147_v23 = vpop.xlane.xlu1 %1146 }
 0x5f6   :  { %4769 = vrcp.f32 %v1147_v23 }
 0x5f7   :  { %v4762_v24 = vpop.eup %4761 }
 0x5f8   :  { %v1161_v25 = vmul.f32 %v4762_v24, %v4746_v49  ;;  %v1150_v26 = vpop.xlane.xlu0 %1149 }
 0x5f9   :  { %4771 = vrcp.f32 %v1150_v26  ;;  %v1700_v16 = vpop.permute.xlu1 %1699 }
 0x5fa   :  { %4428 = vmatmul.mubr.msk.f32.vlgmr.msra.gmra.mrb[10].mxu0 %vm444_vm9, %v1161_v25 }
 0x5fb   :  { %v4764_v27 = vpop.eup %4763  ;;  %4436 = vmatpush3.msra.mxu0 %v1472_v1  ;;  %4437 = vmatprep.mubr.msk.f32.mxu0 %vm4855_vm8, %v4854_v13 }
 0x5fc   :  { %v4766_v28 = vpop.eup %4765  ;;  %v1162_v29 = vmul.f32 %v4764_v27, %v4748_v53  ;;  %4445 = vmatprep.subr.mxu0 %v4854_v13  ;;  %v1624_v30 = vpop.permute.xlu0 %1623  ;;  %v1951_v27 = vld [vmem:[%s5665_s14 + $0x10] sm:$0xff] }
 0x5fd   :  { %v1163_v11 = vmul.f32 %v4766_v28, %v4750_v54 }
 0x5fe   :  { %4433 = vmatmul.mubr.msk.f32.vlgmr.msra.gmra.mrb[14].mxu1 %vm444_vm9, %v1162_v29  ;;  %v1952_v29 = vld [vmem:[%s5665_s14 + $0x18] sm:$0xff] }
 0x5ff   :  { %v4768_v14 = vpop.eup %4767  ;;  %4438 = vmatmul.mubr.msk.f32.vlgmr.msra.gmra.mrb[12].mxu0 %vm444_vm9, %v1163_v11  ;;  %4441 = vmatpush3.msra.mxu1 %v1548_v4  ;;  %v4660_v11 = vpack.c.bf16 %v1952_v29, %v1951_v27 }
 0x600   :  { %v4770_v12 = vpop.eup %4769  ;;  %v1164_v8 = vmul.f32 %v4768_v14, %v4752_v57  ;;  %4446 = vmatpush3.msra.mxu0 %v1624_v30  ;;  %4442 = vmatprep.mubr.msk.f32.mxu1 %vm4855_vm8, %v4854_v13 }
 0x601   :  { %v1165_v18 = vmul.f32 %v4770_v12, %v4754_v58  ;;  %4447 = vmatprep.mubr.msk.f32.mxu0 %vm4855_vm8, %v4854_v13  ;;  %4450 = vmatprep.subr.mxu1 %v4854_v13 }
 0x602   :  { %4443 = vmatmul.mubr.msk.f32.vlgmr.msra.gmra.mrb[16].mxu1 %vm444_vm9, %v1164_v8 }
 0x603   :  { %v4772_v31 = vpop.eup %4771  ;;  %4448 = vmatmul.mubr.msk.f32.vlgmr.msra.gmra.mrb[14].mxu0 %vm444_vm9, %v1165_v18  ;;  %4451 = vmatpush3.msra.mxu1 %v1700_v16 }
 0x604   :  { %v1166_v32 = vmul.f32 %v4772_v31, %v5208_v61  ;;  %4452 = vmatprep.mubr.msk.f32.mxu1 %vm4855_vm8, %v4854_v13  ;;  %4649 = vmatprep.subr.bf16.mxu1 %v4648_v40 }
 0x606   :  { %4453 = vmatmul.mubr.msk.f32.vlgmr.msra.gmra.mrb[18].mxu1 %vm444_vm9, %v1166_v32 }
 0x607   :  { %4651 = vmatpush3.bf16.msra.mxu1 %v4648_v40 }
 0x608   :  { %4653 = vmatprep.subr.bf16.mxu1 %v4652_v43 }
 0x60b   :  { %4655 = vmatpush3.bf16.msra.mxu1 %v4652_v43 }
 0x674   :  { %v1315_v33 = vpop.f32.mrb[12].mxu1 }
 0x675   :  { %v4424_v34 = vpop.f32.mrb[13].mxu1 }
 0x679   :  { %v1239_v36 = vpop.f32.mrb[8].mxu0 }
 0x67a   :  { %v4419_v37 = vpop.f32.mrb[9].mxu0 }
 0x6cd   :  { %v1391_v44 = vpop.f32.mrb[10].mxu0 }
 0x6ce   :  { %1777 = vrot.lane.b32.xlu0 %v1391_v44, %s4861_s26  ;;  %v4429_v45 = vpop.f32.mrb[11].mxu0  ;;  %v4133_v44 = vld [vmem:[%s5664_s13] ss:$0 sm:$0xff] }
 0x6d1   :  { %v1467_v46 = vpop.f32.mrb[14].mxu1 }
 0x6d2   :  { %v1543_v47 = vpop.f32.mrb[12].mxu0  ;;  %1779 = vrot.lane.b32.xlu1 %v1467_v46, %s4861_s26  ;;  %v4434_v48 = vpop.f32.mrb[15].mxu1 }
 0x6d3   :  { %1785 = vrot.lane.b32.xlu0 %v1543_v47, %s4862_s29  ;;  %v4439_v49 = vpop.f32.mrb[13].mxu0 }
 0x6d5   :  { %v1619_v50 = vpop.f32.mrb[16].mxu1 }
 0x6d6   :  { %v1695_v51 = vpop.f32.mrb[14].mxu0  ;;  %1787 = vrot.lane.b32.xlu1 %v1619_v50, %s4862_s29  ;;  %v4444_v52 = vpop.f32.mrb[17].mxu1 }
 0x6d7   :  { %1793 = vrot.lane.b32.xlu0 %v1695_v51, %s4863_s30  ;;  %v4449_v53 = vpop.f32.mrb[15].mxu0  ;;  %v2059_v52 = vld [vmem:[%s5667_s16] sm:$0xff] }
 0x6d8   :  { %v2060_v53 = vld [vmem:[%s5667_s16 + $0x8] sm:$0xff] }
 0x6d9   :  { %v1771_v54 = vpop.f32.mrb[18].mxu1 }
 0x6da   :  { %1795 = vrot.lane.b32.xlu1 %v1771_v54, %s4863_s30  ;;  %v4454_v55 = vpop.f32.mrb[19].mxu1  ;;  %v2061_v54 = vld [vmem:[%s5667_s16 + $0x10] sm:$0xff] }
 0x6db   :  { %v4664_v55 = vpack.c.bf16 %v2060_v53, %v2059_v52 }
 0x6dd   :  { %4665 = vmatprep.subr.bf16.mxu0 %v4664_v55 }
 0x6de   :  { %4667 = vmatpush3.bf16.msra.mxu0 %v4664_v55 }
 0x740   :  { %v1778_v56 = vpop.permute.xlu0 %1777 }
 0x741   :  { %v1799_v59 = vsel %vm444_vm9, %v1239_v36, %v1778_v56  ;;  %v2062_v56 = vld [vmem:[%s5667_s16 + $0x18] sm:$0xff] }
 0x744   :  { %v1780_v57 = vpop.permute.xlu1 %1779 }
 0x745   :  { %v1786_v58 = vpop.permute.xlu0 %1785  ;;  %v1800_v0 = vsel %vm444_vm9, %v1315_v33, %v1780_v57  ;;  %v4668_v57 = vpack.c.bf16 %v2062_v56, %v2061_v54 }
 0x746   :  { %v1802_v61 = vsel %vm1801_vm10, %v1799_v59, %v1786_v58  ;;  %v2063_v58 = vld [vmem:[%s5667_s16 + $0x20] sm:$0xff]  ;;  %v2064_v59 = vld [vmem:[%s5667_s16 + $0x28] sm:$0xff] }
 0x747   :  { %4669 = vmatprep.subr.bf16.mxu0 %v4668_v57 }
 0x748   :  { %v1788_v60 = vpop.permute.xlu1 %1787  ;;  %4671 = vmatpush3.bf16.msra.mxu0 %v4668_v57 }
 0x749   :  { %v1794_v62 = vpop.permute.xlu0 %1793  ;;  %v1803_v1 = vsel %vm1801_vm10, %v1800_v0, %v1788_v60  ;;  %v4672_v60 = vpack.c.bf16 %v2064_v59, %v2063_v58  ;;  %v4134_v0 = vld [vmem:[%s5688_s6] ss:$0 sm:$0xff] }
 0x74a   :  { %v1805_v63 = vsel %vm1804_vm11, %v1802_v61, %v1794_v62  ;;  %v2065_v61 = vld [vmem:[%s5667_s16 + $0x30] sm:$0xff]  ;;  %v2066_v62 = vld [vmem:[%s5667_s16 + $0x38] sm:$0xff] }
 0x74b   :  { %4463 = vmatprep.mubr.msk.f32.mxu1 %vm280_vm7, %v1805_v63  ;;  %4673 = vmatprep.subr.bf16.mxu0 %v4672_v60  ;;  %v4676_v63 = vpack.c.bf16 %v2066_v62, %v2065_v61  ;;  %v4140_v62 = vld [vmem:[%s5669_s18] ss:$0 sm:$0xff] }
 0x74c   :  { %v1796_v2 = vpop.permute.xlu1 %1795  ;;  %4675 = vmatpush3.bf16.msra.mxu0 %v4672_v60 }
 0x74d   :  { %v1806_v4 = vsel %vm1804_vm11, %v1803_v1, %v1796_v2  ;;  %4677 = vmatprep.subr.bf16.mxu0 %v4676_v63 }
 0x74e   :  { %4464 = vmatmul.mubr.msk.f32.vlgmr.msra.gmra.mrb[20].mxu1 %vm280_vm7, %v1806_v4 }
 0x750   :  { %4679 = vmatpush3.bf16.msra.mxu0 %v4676_v63 }
 0x751   :  { %4517 = vmatprep.subr.mxu0 %v4854_v13 }
 0x821   :  { %v4465_v7 = vpop.f32.mrb[20].mxu1 }
 0x822   :  { %v1896_v10 = vadd.f32 %v4465_v7, %v4129_v6  ;;  %v1890_v19 = vpop.f32.mrb[21].mxu1 }
 0x823   :  { %v1891_v15 = vadd.f32 %v4129_v6, %v1890_v19 }
 0x824   :  { %v1900_v17 = vadd.f32 %v1896_v10, %v5051_v5  ;;  %v1949_v5 = vld [vmem:[%s5665_s14] sm:$0xff] }
 0x825   :  { %v1899_v20 = vadd.f32 %v1891_v15, %v5047_v3  ;;  %v1950_v3 = vld [vmem:[%s5665_s14 + $0x8] sm:$0xff] }
 0x826   :  { %v1906_v21 = vsel %vm280_vm7, %v1900_v17, 0.0  ;;  %v1912_v25 = vmul.f32 %v1900_v17, %v1900_v17  ;;  %v4656_v28 = vpack.c.bf16 %v1950_v3, %v1949_v5 }
 0x827   :  { %1907 = vadd.xlane.f32.xlu1 %v1906_v21  ;;  %v1903_v22 = vsel %vm280_vm7, %v1899_v20, 0.0  ;;  %v1911_v23 = vmul.f32 %v1899_v20, %v1899_v20 }
 0x828   :  { %1904 = vadd.xlane.f32.xlu0 %v1903_v22  ;;  %v1916_v26 = vsel %vm280_vm7, %v1912_v25, 0.0  ;;  %4657 = vmatprep.subr.bf16.mxu1 %v4656_v28 }
 0x829   :  { %v1913_v24 = vsel %vm280_vm7, %v1911_v23, 0.0  ;;  %4659 = vmatpush3.bf16.msra.mxu1 %v4656_v28 }
 0x82a   :  { %4661 = vmatprep.subr.bf16.mxu1 %v4660_v11 }
 0x82c   :  { %1914 = vadd.xlane.f32.xlu0 %v1913_v24 }
 0x82d   :  { %4663 = vmatpush3.bf16.msra.mxu1 %v4660_v11 }
 0x830   :  { %1917 = vadd.xlane.f32.xlu0 %v1916_v26 }
 0x8b4   :  { %v1908_v12 = vpop.xlane.xlu1 %1907 }
 0x8b5   :  { %v1905_v30 = vpop.xlane.xlu0 %1904  ;;  %v1910_v18 = vmul.f32 0.03125, %v1908_v12 }
 0x8b6   :  { %v1909_v14 = vmul.f32 0.03125, %v1905_v30  ;;  %v4137_v30 = vld [vmem:[%s5668_s17] ss:$0 sm:$0xff] }
 0x8b7   :  { %v1922_v34 = vmul.f32 %v1910_v18, %v1910_v18  ;;  %v1926_v45 = vsub.f32 %v1900_v17, %v1910_v18 }
 0x8b8   :  { %v1921_v16 = vmul.f32 %v1909_v14, %v1909_v14  ;;  %v1925_v40 = vsub.f32 %v1899_v20, %v1909_v14 }
 0x8b9   :  { %v1915_v8 = vpop.xlane.xlu0 %1914 }
 0x8ba   :  { %v1919_v31 = vmul.f32 0.03125, %v1915_v8 }
 0x8bc   :  { %v1923_v32 = vsub.f32 %v1919_v31, %v1921_v16 }
 0x8bd   :  { %v1918_v33 = vpop.xlane.xlu0 %1917 }
 0x8be   :  { %v1927_v36 = vadd.f32 1e-12, %v1923_v32  ;;  %v1920_v37 = vmul.f32 0.03125, %v1918_v33 }
 0x8c0   :  { %4773 = vrsqrt.f32 %v1927_v36  ;;  %v1924_v38 = vsub.f32 %v1920_v37, %v1922_v34 }
 0x8c2   :  { %v1928_v39 = vadd.f32 1e-12, %v1924_v38 }
 0x8c4   :  { %4775 = vrsqrt.f32 %v1928_v39  ;;  %v4142_v39 = vld [vmem:[%s5659_s8 + $0x20] sm:$0xff] }
 0x8ca   :  { %v4774_v41 = vpop.eup %4773 }
 0x8cb   :  { %v1931_v43 = vmul.f32 %v4774_v41, %v1925_v40  ;;  %v4143_v40 = vld [vmem:[%s5659_s8 + $0x28] sm:$0xff]  ;;  %v4144_v41 = vld [vmem:[%s5659_s8 + $0x30] sm:$0xff] }
 0x8cd   :  { %v1939_v46 = vmul.f32 %v4132_v42, %v1931_v43  ;;  %v4145_v43 = vld [vmem:[%s5659_s8 + $0x38] sm:$0xff] }
 0x8ce   :  { %v4776_v47 = vpop.eup %4775 }
 0x8cf   :  { %v1932_v48 = vmul.f32 %v4776_v47, %v1926_v45  ;;  %v1947_v49 = vadd.f32 %v4133_v44, %v1939_v46 }
 0x8d1   :  { %v1940_v50 = vmul.f32 %v4132_v42, %v1932_v48  ;;  %4474 = vmatprep.mubr.msk.f32.mxu1 %vm280_vm7, %v1947_v49  ;;  %v4680_v42 = vpack.c.bf16 %v4143_v40, %v4142_v39 }
 0x8d3   :  { %v1948_v51 = vadd.f32 %v4133_v44, %v1940_v50  ;;  %v4684_v44 = vpack.c.bf16 %v4145_v43, %v4144_v41  ;;  %4681 = vmatprep.subr.bf16.mxu1 %v4680_v42 }
 0x8d5   :  { %4475 = vmatmul.mubr.msk.f32.vlgmr.msra.gmra.mrb[22].mxu1 %vm280_vm7, %v1948_v51 }
 0x8d6   :  { %4683 = vmatpush3.bf16.msra.mxu1 %v4680_v42 }
 0x8d7   :  { %4685 = vmatprep.subr.bf16.mxu1 %v4684_v44 }
 0x8da   :  { %4687 = vmatpush3.bf16.msra.mxu1 %v4684_v44 }
 0x8db   :  { %4507 = vmatprep.subr.mxu1 %v4854_v13 }
 0x9a8   :  { %v4476_v1 = vpop.f32.mrb[22].mxu1 }
 0x9a9   :  { %v2038_v2 = vadd.f32 %v4476_v1, %v4134_v0  ;;  %v2032_v4 = vpop.f32.mrb[23].mxu1 }
 0x9aa   :  { %v2033_v6 = vadd.f32 %v4134_v0, %v2032_v4 }
 0x9ab   :  { %v2044_v7 = vmul.f32 0.044715, %v2038_v2  ;;  %v2042_v28 = vmul.f32 0.5, %v2038_v2 }
 0x9ac   :  { %v2043_v10 = vmul.f32 0.044715, %v2033_v6  ;;  %v2041_v3 = vmul.f32 0.5, %v2033_v6 }
 0x9ad   :  { %v2046_v19 = vmul.f32 %v2044_v7, %v2038_v2 }
 0x9ae   :  { %v2045_v15 = vmul.f32 %v2043_v10, %v2033_v6 }
 0x9af   :  { %v2048_v17 = vmul.f32 %v2046_v19, %v2038_v2  ;;  %v4147_v19 = vld [vmem:[%s5660_s9 + $0x1] ss:$0 sm:$0xff] }
 0x9b0   :  { %v2047_v20 = vmul.f32 %v2045_v15, %v2033_v6 }
 0x9b1   :  { %v2050_v21 = vadd.f32 %v2048_v17, %v2038_v2  ;;  %v4141_v2 = vld [vmem:[%s5670_s19] ss:$0 sm:$0xff] }
 0x9b2   :  { %v2049_v22 = vadd.f32 %v2047_v20, %v2033_v6 }
 0x9b3   :  { %v2052_v23 = vmul.f32 0.7978846, %v2050_v21 }
 0x9b4   :  { %v2051_v24 = vmul.f32 0.7978846, %v2049_v22 }
 0x9b5   :  { %4777 = vtanh.f32 %v2052_v23 }
 0x9b6   :  { %4779 = vtanh.f32 %v2051_v24 }
 0x9bf   :  { %v4778_v25 = vpop.eup %4777 }
 0x9c0   :  { %v4780_v26 = vpop.eup %4779  ;;  %v2056_v5 = vadd.f32 1.0, %v4778_v25 }
 0x9c1   :  { %v2055_v27 = vadd.f32 1.0, %v4780_v26 }
 0x9c2   :  { %v2058_v11 = vmul.f32 %v2056_v5, %v2042_v28 }
 0x9c3   :  { %v2057_v29 = vmul.f32 %v2055_v27, %v2041_v3 }
 0x9c5   :  { %4493 = vmatprep.mubr.msk.f32.mxu0 %vm2074_vm12, %v2057_v29 }
 0x9c6   :  { %4494 = vmatmul.mubr.msk.f32.vlgmr.msra.gmra.mrb[16].mxu0 %vm2074_vm12, %v2058_v11 }
 0x9c7   :  { %4519 = vmatprep.mubr.msk.f32.mxu0 %vm4855_vm8, %v4854_v13 }
 0xa99   :  { %v4495_v14 = vpop.f32.mrb[16].mxu0 }
 0xa9a   :  { %v2153_v12 = vadd.f32 %v4495_v14, %v4137_v30  ;;  %v2147_v8 = vpop.f32.mrb[17].mxu0 }
 0xa9b   :  { %v2148_v18 = vadd.f32 %v4137_v30, %v2147_v8 }
 0xa9c   :  { %v2157_v16 = vadd.f32 %v2153_v12, %v1948_v51 }
 0xa9d   :  { %v2156_v31 = vadd.f32 %v2148_v18, %v1947_v49 }
 0xa9e   :  { %v2163_v32 = vsel %vm280_vm7, %v2157_v16, 0.0  ;;  %v2169_v33 = vmul.f32 %v2157_v16, %v2157_v16 }
 0xa9f   :  { %2164 = vadd.xlane.f32.xlu0 %v2163_v32  ;;  %v2160_v34 = vsel %vm280_vm7, %v2156_v31, 0.0  ;;  %v2168_v36 = vmul.f32 %v2156_v31, %v2156_v31 }
 0xaa0   :  { %2161 = vadd.xlane.f32.xlu1 %v2160_v34  ;;  %v2173_v37 = vsel %vm280_vm7, %v2169_v33, 0.0 }
 0xaa1   :  { %v2170_v38 = vsel %vm280_vm7, %v2168_v36, 0.0 }
 0xaa3   :  { %2174 = vadd.xlane.f32.xlu0 %v2173_v37 }
 0xaa4   :  { %2171 = vadd.xlane.f32.xlu1 %v2170_v38 }
 0xb2c   :  { %v2165_v45 = vpop.xlane.xlu0 %2164 }
 0xb2d   :  { %v2167_v46 = vmul.f32 0.03125, %v2165_v45  ;;  %v2162_v47 = vpop.xlane.xlu1 %2161 }
 0xb2e   :  { %v2166_v48 = vmul.f32 0.03125, %v2162_v47 }
 0xb2f   :  { %v2179_v50 = vmul.f32 %v2167_v46, %v2167_v46  ;;  %v2183_v59 = vsub.f32 %v2157_v16, %v2167_v46 }
 0xb30   :  { %v2175_v49 = vpop.xlane.xlu0 %2174  ;;  %v2178_v53 = vmul.f32 %v2166_v48, %v2166_v48  ;;  %v2182_v61 = vsub.f32 %v2156_v31, %v2166_v48 }
 0xb31   :  { %v2177_v51 = vmul.f32 0.03125, %v2175_v49  ;;  %v2172_v52 = vpop.xlane.xlu1 %2171 }
 0xb32   :  { %v2176_v54 = vmul.f32 0.03125, %v2172_v52 }
 0xb33   :  { %v2181_v55 = vsub.f32 %v2177_v51, %v2179_v50 }
 0xb34   :  { %v2180_v56 = vsub.f32 %v2176_v54, %v2178_v53 }
 0xb35   :  { %v2185_v57 = vadd.f32 1e-12, %v2181_v55 }
 0xb36   :  { %v2184_v58 = vadd.f32 1e-12, %v2180_v56 }
 0xb37   :  { %4781 = vrsqrt.f32 %v2185_v57 }
 0xb38   :  { %4783 = vrsqrt.f32 %v2184_v58 }
 0xb41   :  { %v4782_v60 = vpop.eup %4781 }
 0xb42   :  { %v4784_v63 = vpop.eup %4783  ;;  %v2189_v0 = vmul.f32 %v4782_v60, %v2183_v59 }
 0xb43   :  { %v2188_v1 = vmul.f32 %v4784_v63, %v2182_v61 }
 0xb44   :  { %v2197_v4 = vmul.f32 %v4140_v62, %v2189_v0 }
 0xb45   :  { %v2196_v6 = vmul.f32 %v4140_v62, %v2188_v1 }
 0xb46   :  { %v5358_v10 = vadd.f32 %v4141_v2, %v2197_v4 }
 0xb47   :  { %v5356_v7 = vadd.f32 %v4141_v2, %v2196_v6 }
 0xb49   :  { %4504 = vmatprep.mubr.msk.f32.mxu1 %vm280_vm7, %v5356_v7 }
 0xb4a   :  { %4505 = vmatmul.mubr.msk.f32.vlgmr.msra.gmra.mrb[24].mxu1 %vm280_vm7, %v5358_v10 }
 0xb4b   :  { %4509 = vmatprep.mubr.msk.f32.mxu1 %vm4855_vm8, %v4854_v13 }
 0xc1d   :  { %v4506_v15 = vpop.f32.mrb[24].mxu1 }
 0xc1e   :  { %v5369_v17 = vadd.f32 %v4506_v15, %v4147_v19  ;;  %v2291_v20 = vpop.f32.mrb[25].mxu1 }
 0xc1f   :  { %v5371_v21 = vadd.f32 %v4147_v19, %v2291_v20 }
 0xc20   :  { %2304 = vrot.lane.b32.xlu0 %v5369_v17, %s4856_s7 }
 0xc21   :  { %2302 = vrot.lane.b32.xlu1 %v5371_v21, %s4856_s7 }
 0xc24   :  { %2310 = vrot.lane.b32.xlu0 %v5371_v21, %s4857_s27 }
 0xc25   :  { %2306 = vrot.lane.b32.xlu1 %v5371_v21, %s4858_s28 }
 0xc28   :  { %2314 = vrot.lane.b32.xlu0 %v5371_v21, %s4859_s4 }
 0xc29   :  { %2308 = vrot.lane.b32.xlu1 %v5369_v17, %s4858_s28 }
 0xc2d   :  { %2312 = vrot.lane.b32.xlu1 %v5369_v17, %s4857_s27 }
 0xc31   :  { %2390 = vrot.lane.b32.xlu1 %v5369_v17, %s4859_s4 }
 0xc92   :  { %v5389_v22 = vpop.permute.xlu0 %2304 }
 0xc93   :  { %2542 = vrot.lane.b32.xlu1 %v5389_v22, %s4859_s4  ;;  %v5393_v23 = vpop.permute.xlu1 %2302 }
 0xc94   :  { %2466 = vrot.lane.b32.xlu0 %v5393_v23, %s4859_s4 }
 0xc96   :  { %v5397_v24 = vpop.permute.xlu0 %2310 }
 0xc97   :  { %v5399_v25 = vpop.permute.xlu1 %2306 }
 0xc98   :  { %2618 = vrot.lane.b32.xlu0 %v5399_v25, %s4859_s4 }
 0xc9a   :  { %v2315_v26 = vpop.permute.xlu0 %2314 }
 0xc9b   :  { %4508 = vmatpush3.xpose.msk.msra.mxu1 %vm444_vm9, %v2315_v26  ;;  %v5404_v5 = vpop.permute.xlu1 %2308 }
 0xc9c   :  { %2770 = vrot.lane.b32.xlu0 %v5397_v24, %s4859_s4  ;;  %2694 = vrot.lane.b32.xlu1 %v5404_v5, %s4859_s4 }
 0xc9d   :  { %4512 = vmatprep.subr.mxu1 %v4854_v13 }
 0xc9e   :  { %4510 = vmatmul.mubr.msk.f32.vlgmr.msra.gmra.mrb[26].mxu1 %vm444_vm9, %v5371_v21 }
 0xc9f   :  { %v5413_v3 = vpop.permute.xlu1 %2312  ;;  %4514 = vmatprep.mubr.msk.f32.mxu1 %vm4855_vm8, %v4854_v13 }
 0xca0   :  { %2846 = vrot.lane.b32.xlu1 %v5413_v3, %s4859_s4 }
 0xca3   :  { %v2391_v27 = vpop.permute.xlu1 %2390 }
 0xca4   :  { %4513 = vmatpush3.xpose.msk.msra.mxu1 %vm444_vm9, %v2391_v27 }
 0xca5   :  { %4522 = vmatprep.subr.mxu1 %v4854_v13 }
 0xca7   :  { %4515 = vmatmul.mubr.msk.f32.vlgmr.msra.gmra.mrb[28].mxu1 %vm444_vm9, %v5369_v17 }
 0xca8   :  { %4524 = vmatprep.mubr.msk.f32.mxu1 %vm4855_vm8, %v4854_v13 }
 0xd05   :  { %v2543_v28 = vpop.permute.xlu1 %2542 }
 0xd06   :  { %v2467_v29 = vpop.permute.xlu0 %2466  ;;  %4523 = vmatpush3.xpose.msk.msra.mxu1 %vm444_vm9, %v2543_v28 }
 0xd07   :  { %4518 = vmatpush3.xpose.msk.msra.mxu0 %vm444_vm9, %v2467_v29  ;;  %4532 = vmatprep.subr.mxu1 %v4854_v13 }
 0xd08   :  { %4527 = vmatprep.subr.mxu0 %v4854_v13 }
 0xd09   :  { %4525 = vmatmul.mubr.msk.f32.vlgmr.msra.gmra.mrb[30].mxu1 %vm444_vm9, %v5389_v22 }
 0xd0a   :  { %4520 = vmatmul.mubr.msk.f32.vlgmr.msra.gmra.mrb[18].mxu0 %vm444_vm9, %v5393_v23  ;;  %v2619_v11 = vpop.permute.xlu0 %2618  ;;  %4534 = vmatprep.mubr.msk.f32.mxu1 %vm4855_vm8, %v4854_v13 }
 0xd0b   :  { %4528 = vmatpush3.xpose.msk.msra.mxu0 %vm444_vm9, %v2619_v11  ;;  %4529 = vmatprep.mubr.msk.f32.mxu0 %vm4855_vm8, %v4854_v13 }
 0xd0c   :  { %4537 = vmatprep.subr.mxu0 %v4854_v13 }
 0xd0e   :  { %4530 = vmatmul.mubr.msk.f32.vlgmr.msra.gmra.mrb[20].mxu0 %vm444_vm9, %v5399_v25  ;;  %v2771_v30 = vpop.permute.xlu0 %2770  ;;  %v2695_v14 = vpop.permute.xlu1 %2694 }
 0xd0f   :  { %4533 = vmatpush3.xpose.msk.msra.mxu1 %vm444_vm9, %v2695_v14  ;;  %4538 = vmatpush3.xpose.msk.msra.mxu0 %vm444_vm9, %v2771_v30 }
 0xd10   :  { %4539 = vmatprep.mubr.msk.f32.mxu0 %vm4855_vm8, %v4854_v13  ;;  %4542 = vmatprep.subr.mxu1 %v4854_v13 }
 0xd11   :  { %4547 = vmatprep.subr.mxu0 %v4854_v13 }
 0xd12   :  { %4535 = vmatmul.mubr.msk.f32.vlgmr.msra.gmra.mrb[32].mxu1 %vm444_vm9, %v5404_v5  ;;  %4540 = vmatmul.mubr.msk.f32.vlgmr.msra.gmra.mrb[22].mxu0 %vm444_vm9, %v5397_v24  ;;  %v2847_v12 = vpop.permute.xlu1 %2846 }
 0xd13   :  { %4543 = vmatpush3.xpose.msk.msra.mxu1 %vm444_vm9, %v2847_v12  ;;  %4544 = vmatprep.mubr.msk.f32.mxu1 %vm4855_vm8, %v4854_v13 }
 0xd14   :  { %4552 = vmatprep.subr.mxu1 %v4854_v13  ;;  %4549 = vmatprep.mubr.msk.f32.mxu0 %vm4855_vm8, %v4854_v13 }
 0xd16   :  { %4545 = vmatmul.mubr.msk.f32.vlgmr.msra.gmra.mrb[34].mxu1 %vm444_vm9, %v5413_v3 }
 0xd17   :  { %4554 = vmatprep.mubr.msk.f32.mxu1 %vm4855_vm8, %v4854_v13 }
 0xd71   :  { %v2386_v8 = vpop.f32.mrb[26].mxu1 }
 0xd72   :  { %v2922_v18 = vmul.f32 0.35355338, %v2386_v8  ;;  %v4511_v16 = vpop.f32.mrb[27].mxu1 }
 0xd74   :  { %v2930_v31 = vadd.f32 %v2922_v18, %v5161_v35 }
 0xd76   :  { %v2938_v32 = vsel %vm444_vm9, %v2930_v31, -inf }
 0xd77   :  { %2939 = vmax.xlane.f32.xlu0 %v2938_v32 }
 0xd7a   :  { %v2462_v33 = vpop.f32.mrb[28].mxu1 }
 0xd7b   :  { %v2923_v34 = vmul.f32 0.35355338, %v2462_v33  ;;  %v4516_v36 = vpop.f32.mrb[29].mxu1 }
 0xd7d   :  { %v2931_v37 = vadd.f32 %v2923_v34, %v5165_v9 }
 0xd7f   :  { %v2941_v38 = vsel %vm444_vm9, %v2931_v37, -inf }
 0xd80   :  { %2942 = vmax.xlane.f32.xlu1 %v2941_v38 }
 0xddc   :  { %v2614_v39 = vpop.f32.mrb[30].mxu1 }
 0xddd   :  { %v2925_v40 = vmul.f32 0.35355338, %v2614_v39  ;;  %v2538_v41 = vpop.f32.mrb[18].mxu0  ;;  %v4526_v42 = vpop.f32.mrb[31].mxu1 }
 0xdde   :  { %v2924_v43 = vmul.f32 0.35355338, %v2538_v41  ;;  %v4521_v44 = vpop.f32.mrb[19].mxu0 }
 0xddf   :  { %v2933_v47 = vadd.f32 %v2925_v40, %v5165_v9 }
 0xde0   :  { %v2932_v45 = vadd.f32 %v2924_v43, %v5161_v35 }
 0xde1   :  { %v2690_v46 = vpop.f32.mrb[20].mxu0  ;;  %v2947_v54 = vsel %vm444_vm9, %v2933_v47, -inf }
 0xde2   :  { %v2926_v48 = vmul.f32 0.35355338, %v2690_v46  ;;  %v4531_v49 = vpop.f32.mrb[21].mxu0  ;;  %v2944_v50 = vsel %vm444_vm9, %v2932_v45, -inf }
 0xde3   :  { %2945 = vmax.xlane.f32.xlu0 %v2944_v50 }
 0xde4   :  { %v2934_v51 = vadd.f32 %v2926_v48, %v5161_v35 }
 0xde5   :  { %v2766_v52 = vpop.f32.mrb[32].mxu1  ;;  %v2842_v53 = vpop.f32.mrb[22].mxu0 }
 0xde6   :  { %v2927_v55 = vmul.f32 0.35355338, %v2766_v52  ;;  %v2928_v56 = vmul.f32 0.35355338, %v2842_v53  ;;  %v4536_v57 = vpop.f32.mrb[33].mxu1  ;;  %v4541_v58 = vpop.f32.mrb[23].mxu0 }
 0xde7   :  { %v2950_v59 = vsel %vm444_vm9, %v2934_v51, -inf  ;;  %2948 = vmax.xlane.f32.xlu0 %v2947_v54 }
 0xde8   :  { %2951 = vmax.xlane.f32.xlu1 %v2950_v59  ;;  %v2936_v60 = vadd.f32 %v2928_v56, %v5161_v35  ;;  %v2935_v61 = vadd.f32 %v2927_v55, %v5165_v9 }
 0xde9   :  { %v2918_v62 = vpop.f32.mrb[34].mxu1 }
 0xdea   :  { %v2929_v63 = vmul.f32 0.35355338, %v2918_v62  ;;  %v4546_v0 = vpop.f32.mrb[35].mxu1  ;;  %v2956_v1 = vsel %vm444_vm9, %v2936_v60, -inf  ;;  %v2953_v2 = vsel %vm444_vm9, %v2935_v61, -inf }
 0xdeb   :  { %2954 = vmax.xlane.f32.xlu0 %v2953_v2 }
 0xdec   :  { %2957 = vmax.xlane.f32.xlu1 %v2956_v1  ;;  %v2937_v4 = vadd.f32 %v2929_v63, %v5165_v9 }
 0xdee   :  { %v2959_v6 = vsel %vm444_vm9, %v2937_v4, -inf }
 0xdef   :  { %2960 = vmax.xlane.f32.xlu0 %v2959_v6 }
 0xdfd   :  { %3026 = vrot.lane.b32.xlu1 %v5371_v21, %s4860_s5 }
 0xe01   :  { %3178 = vrot.lane.b32.xlu1 %v5393_v23, %s4860_s5 }
 0xe04   :  { %v2940_v19 = vpop.xlane.xlu0 %2939 }
 0xe05   :  { %3254 = vrot.lane.b32.xlu1 %v5389_v22, %s4860_s5  ;;  %3102 = vrot.lane.b32.xlu0 %v5369_v17, %s4860_s5  ;;  %v2962_v20 = vsub.f32 %v2930_v31, %v2940_v19 }
 0xe07   :  { %v2970_v21 = vmul.f32 1.442695, %v2962_v20 }
 0xe09   :  { %3406 = vrot.lane.b32.xlu1 %v5404_v5, %s4860_s5  ;;  %3330 = vrot.lane.b32.xlu0 %v5399_v25, %s4860_s5 }
 0xe0d   :  { %v2943_v35 = vpop.xlane.xlu1 %2942 }
 0xe0e   :  { %v2963_v9 = vsub.f32 %v2931_v37, %v2943_v35 }
 0xe10   :  { %v2972_v15 = vmul.f32 1.442695, %v2963_v9 }
 0xe12   :  { %4785 = vpow2.f32 %v2972_v15 }
 0xe13   :  { %4787 = vpow2.f32 %v2970_v21 }
 0xe1c   :  { %v5489_v23 = vpop.eup %4785 }
 0xe1d   :  { %v2989_v22 = vsel %vm444_vm9, %v5489_v23, 0.0  ;;  %v5493_v17 = vpop.eup %4787 }
 0xe1e   :  { %v2986_v26 = vsel %vm444_vm9, %v5493_v17, 0.0 }
 0xe28   :  { %2990 = vadd.xlane.f32.xlu0 %v2989_v22 }
 0xe2d   :  { %2987 = vadd.xlane.f32.xlu1 %v2986_v26 }
 0xe70   :  { %v2946_v25 = vpop.xlane.xlu0 %2945 }
 0xe71   :  { %v2964_v5 = vsub.f32 %v2932_v45, %v2946_v25 }
 0xe73   :  { %v2974_v27 = vmul.f32 1.442695, %v2964_v5 }
 0xe74   :  { %v2949_v28 = vpop.xlane.xlu0 %2948 }
 0xe75   :  { %4789 = vpow2.f32 %v2974_v27  ;;  %v2965_v29 = vsub.f32 %v2933_v47, %v2949_v28  ;;  %v2952_v11 = vpop.xlane.xlu1 %2951 }
 0xe76   :  { %v2966_v30 = vsub.f32 %v2934_v51, %v2952_v11  ;;  %v4174_v11 = vld [vmem:[%s5661_s10 + $0x20] sm:$0xff] }
 0xe77   :  { %v2976_v14 = vmul.f32 1.442695, %v2965_v29 }
 0xe78   :  { %v2978_v12 = vmul.f32 1.442695, %v2966_v30  ;;  %v2955_v8 = vpop.xlane.xlu0 %2954  ;;  %v4175_v30 = vld [vmem:[%s5661_s10 + $0x28] sm:$0xff] }
 0xe79   :  { %4791 = vpow2.f32 %v2976_v14  ;;  %v2967_v18 = vsub.f32 %v2935_v61, %v2955_v8  ;;  %v2958_v16 = vpop.xlane.xlu1 %2957  ;;  %v4688_v14 = vpack.c.bf16 %v4175_v30, %v4174_v11  ;;  %v4184_v30 = vld [vmem:[%s5663_s12 + $0x1] ss:$0 sm:$0xff] }
 0xe7a   :  { %4793 = vpow2.f32 %v2978_v12  ;;  %v2968_v31 = vsub.f32 %v2936_v60, %v2958_v16  ;;  %v4177_v12 = vld [vmem:[%s5661_s10 + $0x38] sm:$0xff] }
 0xe7b   :  { %v2980_v32 = vmul.f32 1.442695, %v2967_v18 }
 0xe7c   :  { %v2982_v33 = vmul.f32 1.442695, %v2968_v31  ;;  %v2961_v34 = vpop.xlane.xlu0 %2960 }
 0xe7d   :  { %4795 = vpow2.f32 %v2980_v32  ;;  %v2969_v36 = vsub.f32 %v2937_v4, %v2961_v34  ;;  %v3027_v37 = vpop.permute.xlu1 %3026 }
 0xe7e   :  { %4797 = vpow2.f32 %v2982_v33  ;;  %4548 = vmatpush3.msra.mxu0 %v3027_v37 }
 0xe7f   :  { %v4790_v38 = vpop.eup %4789  ;;  %v2984_v39 = vmul.f32 1.442695, %v2969_v36  ;;  %4557 = vmatprep.subr.mxu0 %v4854_v13 }
 0xe80   :  { %v3103_v40 = vpop.permute.xlu0 %3102  ;;  %v2992_v41 = vsel %vm444_vm9, %v4790_v38, 0.0 }
 0xe81   :  { %4799 = vpow2.f32 %v2984_v39  ;;  %2993 = vadd.xlane.f32.xlu1 %v2992_v41  ;;  %4553 = vmatpush3.msra.mxu1 %v3103_v40  ;;  %v3179_v52 = vpop.permute.xlu1 %3178 }
 0xe82   :  { %4562 = vmatprep.subr.mxu1 %v4854_v13 }
 0xe83   :  { %v4792_v42 = vpop.eup %4791 }
 0xe84   :  { %v4794_v43 = vpop.eup %4793  ;;  %v2995_v44 = vsel %vm444_vm9, %v4792_v42, 0.0  ;;  %v3331_v54 = vpop.permute.xlu0 %3330 }
 0xe85   :  { %2996 = vadd.xlane.f32.xlu0 %v2995_v44  ;;  %v2998_v45 = vsel %vm444_vm9, %v4794_v43, 0.0  ;;  %v3255_v53 = vpop.permute.xlu1 %3254 }
 0xe86   :  { %2999 = vadd.xlane.f32.xlu1 %v2998_v45 }
 0xe87   :  { %v4796_v46 = vpop.eup %4795 }
 0xe88   :  { %v4798_v47 = vpop.eup %4797  ;;  %v3001_v48 = vsel %vm444_vm9, %v4796_v46, 0.0 }
 0xe89   :  { %3002 = vadd.xlane.f32.xlu0 %v3001_v48  ;;  %v3004_v49 = vsel %vm444_vm9, %v4798_v47, 0.0  ;;  %v3407_v56 = vpop.permute.xlu1 %3406 }
 0xe8a   :  { %3005 = vadd.xlane.f32.xlu1 %v3004_v49 }
 0xe8b   :  { %v5504_v50 = vpop.eup %4799 }
 0xe8c   :  { %v3007_v51 = vsel %vm444_vm9, %v5504_v50, 0.0 }
 0xe8d   :  { %3008 = vadd.xlane.f32.xlu0 %v3007_v51 }
 0xe9b   :  { %3558 = vrot.lane.b32.xlu1 %v5413_v3, %s4860_s5 }
 0xea3   :  { %3482 = vrot.lane.b32.xlu0 %v5397_v24, %s4860_s5 }
 0xeb5   :  { %v2991_v55 = vpop.xlane.xlu0 %2990 }
 0xeb6   :  { %4801 = vrcp.f32 %v2991_v55 }
 0xeba   :  { %v2988_v57 = vpop.xlane.xlu1 %2987 }
 0xebb   :  { %4803 = vrcp.f32 %v2988_v57 }
 0xec0   :  { %v4802_v58 = vpop.eup %4801 }
 0xec1   :  { %v3019_v59 = vmul.f32 %v4802_v58, %v5489_v23 }
 0xec3   :  { %4555 = vmatmul.mubr.msk.f32.vlgmr.msra.gmra.mrb[36].mxu1 %vm444_vm9, %v3019_v59 }
 0xec4   :  { %4563 = vmatpush3.msra.mxu1 %v3255_v53  ;;  %4564 = vmatprep.mubr.msk.f32.mxu1 %vm4855_vm8, %v4854_v13 }
 0xec5   :  { %v4804_v3 = vpop.eup %4803  ;;  %4572 = vmatprep.subr.mxu1 %v4854_v13 }
 0xec6   :  { %v3018_v24 = vmul.f32 %v4804_v3, %v5493_v17 }
 0xec8   :  { %4550 = vmatmul.mubr.msk.f32.vlgmr.msra.gmra.mrb[24].mxu0 %vm444_vm9, %v3018_v24 }
 0xec9   :  { %4558 = vmatpush3.msra.mxu0 %v3179_v52  ;;  %4559 = vmatprep.mubr.msk.f32.mxu0 %vm4855_vm8, %v4854_v13 }
 0xeca   :  { %4567 = vmatprep.subr.mxu0 %v4854_v13 }
 0xf0e   :  { %v2994_v60 = vpop.xlane.xlu1 %2993 }
 0xf0f   :  { %4805 = vrcp.f32 %v2994_v60 }
 0xf12   :  { %v2997_v61 = vpop.xlane.xlu0 %2996 }
 0xf13   :  { %4807 = vrcp.f32 %v2997_v61  ;;  %v3000_v62 = vpop.xlane.xlu1 %2999 }
 0xf14   :  { %4809 = vrcp.f32 %v3000_v62 }
 0xf16   :  { %v3003_v63 = vpop.xlane.xlu0 %3002 }
 0xf17   :  { %4811 = vrcp.f32 %v3003_v63  ;;  %v3006_v0 = vpop.xlane.xlu1 %3005 }
 0xf18   :  { %4813 = vrcp.f32 %v3006_v0 }
 0xf19   :  { %v4806_v1 = vpop.eup %4805 }
 0xf1a   :  { %v3020_v2 = vmul.f32 %v4806_v1, %v4790_v38  ;;  %v3009_v4 = vpop.xlane.xlu0 %3008  ;;  %v4188_v1 = vld [vmem:[%s5665_s14 + $0x30] sm:$0xff] }
 0xf1b   :  { %4815 = vrcp.f32 %v3009_v4  ;;  %v3559_v17 = vpop.permute.xlu1 %3558  ;;  %v4189_v4 = vld [vmem:[%s5665_s14 + $0x38] sm:$0xff] }
 0xf1c   :  { %4560 = vmatmul.mubr.msk.f32.vlgmr.msra.gmra.mrb[26].mxu0 %vm444_vm9, %v3020_v2 }
 0xf1d   :  { %v4808_v6 = vpop.eup %4807  ;;  %4568 = vmatpush3.msra.mxu0 %v3331_v54  ;;  %4569 = vmatprep.mubr.msk.f32.mxu0 %vm4855_vm8, %v4854_v13  ;;  %v4179_v54 = vld [vmem:[%s5662_s11 + $0x1] ss:$0 sm:$0xff] }
 0xf1e   :  { %v4810_v35 = vpop.eup %4809  ;;  %v3021_v9 = vmul.f32 %v4808_v6, %v4792_v42  ;;  %4577 = vmatprep.subr.mxu0 %v4854_v13  ;;  %v3483_v15 = vpop.permute.xlu0 %3482  ;;  %v4700_v6 = vpack.c.bf16 %v4189_v4, %v4188_v1 }
 0xf1f   :  { %v3022_v19 = vmul.f32 %v4810_v35, %v4794_v43 }
 0xf20   :  { %4565 = vmatmul.mubr.msk.f32.vlgmr.msra.gmra.mrb[38].mxu1 %vm444_vm9, %v3021_v9 }
 0xf21   :  { %v4812_v20 = vpop.eup %4811  ;;  %4570 = vmatmul.mubr.msk.f32.vlgmr.msra.gmra.mrb[28].mxu0 %vm444_vm9, %v3022_v19  ;;  %4573 = vmatpush3.msra.mxu1 %v3407_v56 }
 0xf22   :  { %v4814_v21 = vpop.eup %4813  ;;  %v3023_v23 = vmul.f32 %v4812_v20, %v4796_v46  ;;  %4578 = vmatpush3.msra.mxu0 %v3483_v15  ;;  %4574 = vmatprep.mubr.msk.f32.mxu1 %vm4855_vm8, %v4854_v13 }
 0xf23   :  { %v3024_v22 = vmul.f32 %v4814_v21, %v4798_v47  ;;  %4579 = vmatprep.mubr.msk.f32.mxu0 %vm4855_vm8, %v4854_v13  ;;  %4582 = vmatprep.subr.mxu1 %v4854_v13 }
 0xf24   :  { %4575 = vmatmul.mubr.msk.f32.vlgmr.msra.gmra.mrb[40].mxu1 %vm444_vm9, %v3023_v23  ;;  %4689 = vmatprep.subr.bf16.mxu0 %v4688_v14 }
 0xf25   :  { %v4816_v26 = vpop.eup %4815  ;;  %4580 = vmatmul.mubr.msk.f32.vlgmr.msra.gmra.mrb[30].mxu0 %vm444_vm9, %v3024_v22  ;;  %4583 = vmatpush3.msra.mxu1 %v3559_v17 }
 0xf26   :  { %v3025_v25 = vmul.f32 %v4816_v26, %v5504_v50  ;;  %4584 = vmatprep.mubr.msk.f32.mxu1 %vm4855_vm8, %v4854_v13  ;;  %4691 = vmatpush3.bf16.msra.mxu0 %v4688_v14  ;;  %v4176_v13 = vld [vmem:[%s5661_s10 + $0x30] sm:$0xff] }
 0xf27   :  { %v4692_v8 = vpack.c.bf16 %v4177_v12, %v4176_v13  ;;  %v4185_v13 = vld [vmem:[%s5664_s13 + $0x1] ss:$0 sm:$0xff] }
 0xf28   :  { %4585 = vmatmul.mubr.msk.f32.vlgmr.msra.gmra.mrb[42].mxu1 %vm444_vm9, %v3025_v25 }
 0xf29   :  { %4693 = vmatprep.subr.bf16.mxu0 %v4692_v8 }
 0xf2a   :  { %4695 = vmatpush3.bf16.msra.mxu0 %v4692_v8 }
 0xf96   :  { %v3174_v5 = vpop.f32.mrb[36].mxu1 }
 0xf97   :  { %v4556_v27 = vpop.f32.mrb[37].mxu1 }
 0xf9b   :  { %v3098_v28 = vpop.f32.mrb[24].mxu0 }
 0xf9c   :  { %v4551_v29 = vpop.f32.mrb[25].mxu0 }
 0xfef   :  { %v3250_v18 = vpop.f32.mrb[26].mxu0 }
 0xff0   :  { %3636 = vrot.lane.b32.xlu0 %v3250_v18, %s4861_s26  ;;  %v4561_v16 = vpop.f32.mrb[27].mxu0 }
 0xff3   :  { %v3326_v31 = vpop.f32.mrb[38].mxu1 }
 0xff4   :  { %v3402_v32 = vpop.f32.mrb[28].mxu0  ;;  %3638 = vrot.lane.b32.xlu1 %v3326_v31, %s4861_s26  ;;  %v4566_v33 = vpop.f32.mrb[39].mxu1 }
 0xff5   :  { %3644 = vrot.lane.b32.xlu0 %v3402_v32, %s4862_s29  ;;  %v4571_v34 = vpop.f32.mrb[29].mxu0 }
 0xff6   :  { %v4194_v34 = vld [vmem:[%s5667_s16 + $0x40] sm:$0xff] }
 0xff7   :  { %v3478_v36 = vpop.f32.mrb[40].mxu1 }
 0xff8   :  { %v3554_v37 = vpop.f32.mrb[30].mxu0  ;;  %3646 = vrot.lane.b32.xlu1 %v3478_v36, %s4862_s29  ;;  %v4576_v38 = vpop.f32.mrb[41].mxu1  ;;  %v4195_v36 = vld [vmem:[%s5667_s16 + $0x48] sm:$0xff] }
 0xff9   :  { %3652 = vrot.lane.b32.xlu0 %v3554_v37, %s4863_s30  ;;  %v4581_v39 = vpop.f32.mrb[31].mxu0  ;;  %v4196_v37 = vld [vmem:[%s5667_s16 + $0x50] sm:$0xff]  ;;  %v4704_v38 = vpack.c.bf16 %v4195_v36, %v4194_v34  ;;  %v4208_v36 = vld [vmem:[%s5669_s18 + $0x1] ss:$0 sm:$0xff] }
 0xffa   :  { %v4197_v39 = vld [vmem:[%s5667_s16 + $0x58] sm:$0xff] }
 0xffb   :  { %v3630_v40 = vpop.f32.mrb[42].mxu1  ;;  %4705 = vmatprep.subr.bf16.mxu0 %v4704_v38 }
 0xffc   :  { %3654 = vrot.lane.b32.xlu1 %v3630_v40, %s4863_s30  ;;  %v4586_v41 = vpop.f32.mrb[43].mxu1  ;;  %v4708_v40 = vpack.c.bf16 %v4197_v39, %v4196_v37 }
 0xffd   :  { %v4198_v41 = vld [vmem:[%s5667_s16 + $0x60] sm:$0xff] }
0x1062   :  { %v3637_v42 = vpop.permute.xlu0 %3636 }
0x1063   :  { %v3658_v45 = vsel %vm444_vm9, %v3098_v28, %v3637_v42  ;;  %v4199_v42 = vld [vmem:[%s5667_s16 + $0x68] sm:$0xff] }
0x1066   :  { %v3639_v43 = vpop.permute.xlu1 %3638 }
0x1067   :  { %v3645_v44 = vpop.permute.xlu0 %3644  ;;  %v3659_v50 = vsel %vm444_vm9, %v3174_v5, %v3639_v43  ;;  %v4712_v43 = vpack.c.bf16 %v4199_v42, %v4198_v41 }
0x1068   :  { %v3660_v47 = vsel %vm1801_vm10, %v3658_v45, %v3645_v44  ;;  %v4200_v44 = vld [vmem:[%s5667_s16 + $0x70] sm:$0xff]  ;;  %v4201_v45 = vld [vmem:[%s5667_s16 + $0x78] sm:$0xff] }
0x106a   :  { %v3647_v46 = vpop.permute.xlu1 %3646 }
0x106b   :  { %v3653_v48 = vpop.permute.xlu0 %3652  ;;  %v3661_v51 = vsel %vm1801_vm10, %v3659_v50, %v3647_v46  ;;  %v4716_v46 = vpack.c.bf16 %v4201_v45, %v4200_v44 }
0x106c   :  { %v3662_v49 = vsel %vm1804_vm11, %v3660_v47, %v3653_v48  ;;  %v4191_v47 = vld [vmem:[%s5688_s6 + $0x1] ss:$0 sm:$0xff] }
0x106d   :  { %4595 = vmatprep.mubr.msk.f32.mxu0 %vm280_vm7, %v3662_v49 }
0x106e   :  { %v3655_v52 = vpop.permute.xlu1 %3654 }
0x106f   :  { %v3663_v53 = vsel %vm1804_vm11, %v3661_v51, %v3655_v52 }
0x1070   :  { %4596 = vmatmul.mubr.msk.f32.vlgmr.msra.gmra.mrb[32].mxu0 %vm280_vm7, %v3663_v53 }
0x1071   :  { %4707 = vmatpush3.bf16.msra.mxu0 %v4704_v38 }
0x1072   :  { %4709 = vmatprep.subr.bf16.mxu0 %v4708_v40 }
0x1075   :  { %4711 = vmatpush3.bf16.msra.mxu0 %v4708_v40  ;;  %v4209_v40 = vld [vmem:[%s5670_s19 + $0x1] ss:$0 sm:$0xff] }
0x1076   :  { %4713 = vmatprep.subr.bf16.mxu0 %v4712_v43 }
0x1079   :  { %4715 = vmatpush3.bf16.msra.mxu0 %v4712_v43 }
0x107a   :  { %4717 = vmatprep.subr.bf16.mxu0 %v4716_v46 }
0x107d   :  { %4719 = vmatpush3.bf16.msra.mxu0 %v4716_v46 }
0x1143   :  { %v4597_v55 = vpop.f32.mrb[32].mxu0 }
0x1144   :  { %v3755_v56 = vadd.f32 %v4597_v55, %v4179_v54  ;;  %v3749_v57 = vpop.f32.mrb[33].mxu0 }
0x1145   :  { %v3750_v58 = vadd.f32 %v4179_v54, %v3749_v57 }
0x1146   :  { %v3759_v59 = vadd.f32 %v3755_v56, %v5358_v10  ;;  %v4186_v10 = vld [vmem:[%s5665_s14 + $0x20] sm:$0xff] }
0x1147   :  { %v3758_v3 = vadd.f32 %v3750_v58, %v5356_v7  ;;  %v4187_v7 = vld [vmem:[%s5665_s14 + $0x28] sm:$0xff] }
0x1148   :  { %v3767_v24 = vsel %vm280_vm7, %v3759_v59, 0.0  ;;  %v3773_v63 = vmul.f32 %v3759_v59, %v3759_v59  ;;  %v4696_v2 = vpack.c.bf16 %v4187_v7, %v4186_v10 }
0x1149   :  { %3768 = vadd.xlane.f32.xlu1 %v3767_v24  ;;  %v3764_v60 = vsel %vm280_vm7, %v3758_v3, 0.0  ;;  %v3772_v61 = vmul.f32 %v3758_v3, %v3758_v3 }
0x114a   :  { %3765 = vadd.xlane.f32.xlu0 %v3764_v60  ;;  %v3777_v0 = vsel %vm280_vm7, %v3773_v63, 0.0  ;;  %4697 = vmatprep.subr.bf16.mxu1 %v4696_v2 }
0x114b   :  { %v3774_v62 = vsel %vm280_vm7, %v3772_v61, 0.0  ;;  %4699 = vmatpush3.bf16.msra.mxu1 %v4696_v2  ;;  %v4203_v2 = vld [vmem:[%s5668_s17 + $0x1] ss:$0 sm:$0xff] }
0x114c   :  { %4701 = vmatprep.subr.bf16.mxu1 %v4700_v6 }
0x114e   :  { %3775 = vadd.xlane.f32.xlu0 %v3774_v62 }
0x114f   :  { %4703 = vmatpush3.bf16.msra.mxu1 %v4700_v6 }
0x1152   :  { %3778 = vadd.xlane.f32.xlu0 %v3777_v0 }
0x11d6   :  { %v3769_v19 = vpop.xlane.xlu1 %3768 }
0x11d7   :  { %v3766_v35 = vpop.xlane.xlu0 %3765  ;;  %v3771_v20 = vmul.f32 0.03125, %v3769_v19 }
0x11d8   :  { %v3770_v9 = vmul.f32 0.03125, %v3766_v35 }
0x11d9   :  { %v3783_v26 = vmul.f32 %v3771_v20, %v3771_v20  ;;  %v3787_v12 = vsub.f32 %v3759_v59, %v3771_v20 }
0x11da   :  { %v3782_v21 = vmul.f32 %v3770_v9, %v3770_v9  ;;  %v3786_v29 = vsub.f32 %v3758_v3, %v3770_v9 }
0x11db   :  { %v3776_v15 = vpop.xlane.xlu0 %3775 }
0x11dc   :  { %v3780_v23 = vmul.f32 0.03125, %v3776_v15 }
0x11de   :  { %v3784_v22 = vsub.f32 %v3780_v23, %v3782_v21 }
0x11df   :  { %v3779_v17 = vpop.xlane.xlu0 %3778 }
0x11e0   :  { %v3788_v25 = vadd.f32 1e-12, %v3784_v22  ;;  %v3781_v5 = vmul.f32 0.03125, %v3779_v17 }
0x11e2   :  { %4817 = vrsqrt.f32 %v3788_v25  ;;  %v3785_v27 = vsub.f32 %v3781_v5, %v3783_v26 }
0x11e4   :  { %v3789_v28 = vadd.f32 1e-12, %v3785_v27 }
0x11e6   :  { %4819 = vrsqrt.f32 %v3789_v28 }
0x11ec   :  { %v4818_v11 = vpop.eup %4817 }
0x11ed   :  { %v3792_v14 = vmul.f32 %v4818_v11, %v3786_v29 }
0x11ef   :  { %v3800_v8 = vmul.f32 %v4184_v30, %v3792_v14 }
0x11f0   :  { %v4820_v18 = vpop.eup %4819 }
0x11f1   :  { %v3793_v16 = vmul.f32 %v4820_v18, %v3787_v12  ;;  %v3808_v31 = vadd.f32 %v4185_v13, %v3800_v8 }
0x11f3   :  { %v3801_v32 = vmul.f32 %v4184_v30, %v3793_v16  ;;  %4606 = vmatprep.mubr.msk.f32.mxu1 %vm280_vm7, %v3808_v31 }
0x11f5   :  { %v3809_v33 = vadd.f32 %v4185_v13, %v3801_v32 }
0x11f7   :  { %4607 = vmatmul.mubr.msk.f32.vlgmr.msra.gmra.mrb[44].mxu1 %vm280_vm7, %v3809_v33 }
0x12ca   :  { %v4608_v48 = vpop.f32.mrb[44].mxu1 }
0x12cb   :  { %v3901_v49 = vadd.f32 %v4608_v48, %v4191_v47  ;;  %v3895_v50 = vpop.f32.mrb[45].mxu1 }
0x12cc   :  { %v3896_v51 = vadd.f32 %v4191_v47, %v3895_v50 }
0x12cd   :  { %v3907_v52 = vmul.f32 0.044715, %v3901_v49  ;;  %v3905_v10 = vmul.f32 0.5, %v3901_v49 }
0x12ce   :  { %v3906_v53 = vmul.f32 0.044715, %v3896_v51  ;;  %v3904_v63 = vmul.f32 0.5, %v3896_v51 }
0x12cf   :  { %v3909_v54 = vmul.f32 %v3907_v52, %v3901_v49 }
0x12d0   :  { %v3908_v55 = vmul.f32 %v3906_v53, %v3896_v51 }
0x12d1   :  { %v3911_v56 = vmul.f32 %v3909_v54, %v3901_v49 }
0x12d2   :  { %v3910_v57 = vmul.f32 %v3908_v55, %v3896_v51 }
0x12d3   :  { %v3913_v58 = vadd.f32 %v3911_v56, %v3901_v49 }
0x12d4   :  { %v3912_v59 = vadd.f32 %v3910_v57, %v3896_v51 }
0x12d5   :  { %v3915_v3 = vmul.f32 0.7978846, %v3913_v58 }
0x12d6   :  { %v3914_v24 = vmul.f32 0.7978846, %v3912_v59 }
0x12d7   :  { %4821 = vtanh.f32 %v3915_v3 }
0x12d8   :  { %4823 = vtanh.f32 %v3914_v24 }
0x12e1   :  { %v4822_v60 = vpop.eup %4821 }
0x12e2   :  { %v4824_v61 = vpop.eup %4823  ;;  %v3919_v62 = vadd.f32 1.0, %v4822_v60 }
0x12e3   :  { %v3918_v0 = vadd.f32 1.0, %v4824_v61 }
0x12e4   :  { %v3921_v1 = vmul.f32 %v3919_v62, %v3905_v10 }
0x12e5   :  { %v3920_v7 = vmul.f32 %v3918_v0, %v3904_v63 }
0x12e7   :  { %4625 = vmatprep.mubr.msk.f32.mxu0 %vm2074_vm12, %v3920_v7 }
0x12e8   :  { %4626 = vmatmul.mubr.msk.f32.vlgmr.msra.gmra.mrb[34].mxu0 %vm2074_vm12, %v3921_v1 }
0x13bb   :  { %v4627_v4 = vpop.f32.mrb[34].mxu0 }
0x13bc   :  { %v4017_v6 = vadd.f32 %v4627_v4, %v4203_v2  ;;  %v4011_v35 = vpop.f32.mrb[35].mxu0 }
0x13bd   :  { %v4012_v9 = vadd.f32 %v4203_v2, %v4011_v35 }
0x13be   :  { %v4021_v19 = vadd.f32 %v4017_v6, %v3809_v33 }
0x13bf   :  { %v4020_v15 = vadd.f32 %v4012_v9, %v3808_v31 }
0x13c0   :  { %v4029_v20 = vsel %vm280_vm7, %v4021_v19, 0.0  ;;  %v4035_v21 = vmul.f32 %v4021_v19, %v4021_v19 }
0x13c1   :  { %4030 = vadd.xlane.f32.xlu0 %v4029_v20  ;;  %v4026_v23 = vsel %vm280_vm7, %v4020_v15, 0.0  ;;  %v4034_v22 = vmul.f32 %v4020_v15, %v4020_v15 }
0x13c2   :  { %4027 = vadd.xlane.f32.xlu1 %v4026_v23  ;;  %v4039_v17 = vsel %vm280_vm7, %v4035_v21, 0.0 }
0x13c3   :  { %v4036_v26 = vsel %vm280_vm7, %v4034_v22, 0.0 }
0x13c5   :  { %4040 = vadd.xlane.f32.xlu0 %v4039_v17 }
0x13c6   :  { %4037 = vadd.xlane.f32.xlu1 %v4036_v26 }
0x144e   :  { %v4031_v25 = vpop.xlane.xlu0 %4030 }
0x144f   :  { %v4033_v5 = vmul.f32 0.03125, %v4031_v25  ;;  %v4028_v27 = vpop.xlane.xlu1 %4027 }
0x1450   :  { %v4032_v28 = vmul.f32 0.03125, %v4028_v27 }
0x1451   :  { %v4045_v11 = vmul.f32 %v4033_v5, %v4033_v5  ;;  %v4049_v32 = vsub.f32 %v4021_v19, %v4033_v5 }
0x1452   :  { %v4041_v29 = vpop.xlane.xlu0 %4040  ;;  %v4044_v13 = vmul.f32 %v4032_v28, %v4032_v28  ;;  %v4048_v34 = vsub.f32 %v4020_v15, %v4032_v28 }
0x1453   :  { %v4043_v30 = vmul.f32 0.03125, %v4041_v29  ;;  %v4038_v14 = vpop.xlane.xlu1 %4037 }
0x1454   :  { %v4042_v12 = vmul.f32 0.03125, %v4038_v14 }
0x1455   :  { %v4047_v8 = vsub.f32 %v4043_v30, %v4045_v11 }
0x1456   :  { %v4046_v18 = vsub.f32 %v4042_v12, %v4044_v13 }
0x1457   :  { %v4051_v16 = vadd.f32 1e-12, %v4047_v8 }
0x1458   :  { %v4050_v31 = vadd.f32 1e-12, %v4046_v18 }
0x1459   :  { %4825 = vrsqrt.f32 %v4051_v16 }
0x145a   :  { %4827 = vrsqrt.f32 %v4050_v31 }
0x1463   :  { %v4826_v33 = vpop.eup %4825 }
0x1464   :  { %v4828_v37 = vpop.eup %4827  ;;  %v4055_v38 = vmul.f32 %v4826_v33, %v4049_v32 }
0x1465   :  { %v4054_v39 = vmul.f32 %v4828_v37, %v4048_v34 }
0x1466   :  { %v4063_v41 = vmul.f32 %v4208_v36, %v4055_v38 }
0x1467   :  { %v4062_v42 = vmul.f32 %v4208_v36, %v4054_v39 }
0x1468   :  { %v4071_v43 = vadd.f32 %v4209_v40, %v4063_v41 }
0x1469   :  { %v4070_v44 = vadd.f32 %v4209_v40, %v4062_v42 }
0x146a   :  { %4073 = vst.msk [vmem:[#allocation2 + $0x8] sm:$0xff] %vm280_vm7, %v4071_v43 }
0x146b   :  { %4072 = vst.msk [vmem:[#allocation2] sm:$0xff] %vm280_vm7, %v4070_v44 }
0x146c   :  { %4840 = shalt.err (!%p4837_p4)
}
0x146d   :  { %s4841_s9 = scalar_lea.hbm %s5671_s20, 256 }
0x146e   :  { %p4842_p5 = scmp.ne.s32.totalorder %s5671_s20, %s4841_s9  ;;  %p4845_p6 = scmp.lt.u32.totalorder %s4841_s9, %s5671_s20 }
0x1470   :  { %p4847_p7 = pnand %p4845_p6, %p4842_p5 }
0x1472   :  { %4850 = shalt.err (!%p4847_p7)
}
0x1473   :  { %s4865_s28 = smov 128  }
0x1474   :  { %4085 = dma.vmem_to_hbm [thread:$0]  %s4080_s15, 256, %s5671_s20, [#allocation3], %s4865_s28, %s4865_s28, %s4861_s26  }
0x1475   :  { %4851 = dma.done.wait [#allocation3], 256  }
0x1476   :  { %4852 = vsyncadd [#allocation3], 4294967040 }
0x1477   :  { %4089 = vsyncpa [#allocation3], 1 }

</bundles_post_ra>
